<compile_context>
chip_gen: v7x
topology: tpu7x:2x2x1
jax: 0.10.0
libtpu: 0.0.40
codegen_flags: <defaults>
</compile_context>

<pallas_src>
import functools

import jax
import jax.numpy as jnp
from jax.experimental import pallas as pl
from jax.experimental.pallas import tpu as pltpu


# ---------------------------------------------------------------------------
# Kernel: grid = (N, 2, n_row_tiles)
#   p == 0 : accumulate gmm / per-channel weighted sums into VMEM scratch,
#            track running max of gmm (masked over real pixels)
#   p == 1 : composite one image row-tile with s = scale / gmax
# ---------------------------------------------------------------------------
def _gmm_anomaly_kernel(par_ref, img_ref, out_ref,
                        gmm_buf, wsum_buf, gmax_buf,
                        *, C, K, H, W, TH, W_pad, padded):
    n = pl.program_id(0)                      # batch element
    p = pl.program_id(1)                      # 0: accumulate, 1: composite
    t = pl.program_id(2)                      # spatial row-tile
    row0 = pl.multiple_of(t * TH, TH)

    f32 = jnp.float32
    x_step = 2.0 / max(W - 1, 1)              # guard W==1 / H==1
    y_step = 2.0 / max(H - 1, 1)

    # Offsets into the packed per-batch parameter row (SMEM):
    #   [cx | cy | mu_x | mu_y | rho | log_pi | color(c-major) | scale]
    o_cx, o_cy, o_mx, o_my, o_rho, o_lpi = 0, K, 2 * K, 3 * K, 4 * K, 5 * K
    o_col, o_scl = 6 * K, 6 * K + C * K

    @pl.when(p == 0)
    def _accumulate():
        rows = jax.lax.broadcasted_iota(jnp.int32, (TH, W_pad), 0) + t * TH
        cols = jax.lax.broadcasted_iota(jnp.int32, (TH, W_pad), 1)
        ys = rows.astype(f32) * y_step - 1.0
        xs = cols.astype(f32) * x_step - 1.0

        gmm = jnp.zeros((TH, W_pad), f32)
        ws = [jnp.zeros((TH, W_pad), f32) for _ in range(C)]
        for k in range(K):                    # static unroll over components
            # g_k = pi_k * exp(-(zx^2 - 2 rho zx zy + zy^2)/(2(1-rho^2)))
            # with 1/(2(1-rho^2)) and 1/sigma folded into cx/cy and log(pi_k)
            # folded into the exponent (done once per (n,k) on the host).
            u = (xs - par_ref[n, o_mx + k]) * par_ref[n, o_cx + k]
            v = (ys - par_ref[n, o_my + k]) * par_ref[n, o_cy + k]
            rho = par_ref[n, o_rho + k]
            g = jnp.exp(par_ref[n, o_lpi + k]
                        - (u * u + v * v - (2.0 * rho) * (u * v)))
            gmm = gmm + g
            for c in range(C):
                ws[c] = ws[c] + g * par_ref[n, o_col + c * K + k]

        gmm_buf[pl.ds(row0, TH), :] = gmm
        for c in range(C):
            wsum_buf[c, pl.ds(row0, TH), :] = ws[c]

        if padded:
            # gmm > 0 at every real pixel, so masking padding to 0 is safe.
            valid = (rows < H) & (cols < W)
            tile_max = jnp.max(jnp.where(valid, gmm, 0.0))
        else:
            tile_max = jnp.max(gmm)

        @pl.when(t == 0)
        def _():
            gmax_buf[...] = jnp.zeros_like(gmax_buf)

        gmax_buf[...] = jnp.maximum(gmax_buf[...], tile_max)

    @pl.when(p == 1)
    def _composite():
        # One (1,1) factor per batch element; exact division (1e-4 tolerance).
        s = par_ref[n, o_scl] / gmax_buf[...]
        gmm = gmm_buf[pl.ds(row0, TH), :]
        for c in range(C):                    # per-channel, no big temporaries
            img_c = img_ref[0, c].astype(f32)
            w_c = wsum_buf[c, pl.ds(row0, TH), :]
            out_ref[0, c] = (img_c + (w_c - img_c * gmm) * s).astype(out_ref.dtype)


# ---------------------------------------------------------------------------
# Wrapper
# ---------------------------------------------------------------------------
def gmm_anomaly_pallas(imageN, params, *, rows_per_tile=None):
    color, mu_x, mu_y, sigma_x, sigma_y, rho, pi, scale = params
    N, C, H, W = imageN.shape
    K = mu_x.reshape(N, -1).shape[-1]

    f32 = jnp.float32
    mu_x = mu_x.reshape(N, K).astype(f32)
    mu_y = mu_y.reshape(N, K).astype(f32)
    sigma_x = sigma_x.reshape(N, K).astype(f32)
    sigma_y = sigma_y.reshape(N, K).astype(f32)
    rho = rho.reshape(N, K).astype(f32)
    pi = pi.reshape(N, K).astype(f32)
    scale = scale.reshape(N, 1).astype(f32)
    color = color.reshape(N, C * K).astype(f32)

    # Fold 1/(2(1-rho^2)) and 1/sigma into the coordinate scales; pi -> log(pi).
    # Tiny (N, K) host-side ops done once.
    inv_norm = jnp.sqrt(0.5 / (1.0 - rho * rho))
    cx = inv_norm / sigma_x
    cy = inv_norm / sigma_y
    lpi = jnp.log(pi)
    par = jnp.concatenate([cx, cy, mu_x, mu_y, rho, lpi, color, scale], axis=1)

    # ---- spatial layout: lane-dense (H_pad, W_pad) with row tiling ----------
    W_pad = max(128, -(-W // 128) * 128)
    pad8_h = -(-H // 8) * 8
    if rows_per_tile is None:
        row_target = (64 * 1024) // W_pad      # ~256 KiB f32 per (TH, W_pad) array
        TH = max(8, (row_target // 8) * 8)
        TH = min(TH, pad8_h)
    else:
        TH = max(8, (rows_per_tile // 8) * 8)
    H_pad = -(-H // TH) * TH
    n_tiles = H_pad // TH
    padded = (H_pad != H) or (W_pad != W)

    img = imageN
    if padded:
        img = jnp.pad(imageN, ((0, 0), (0, 0), (0, H_pad - H), (0, W_pad - W)))

    # ---- explicit VMEM budget -----------------------------------------------
    itemsize = jnp.dtype(imageN.dtype).itemsize
    scratch_bytes = (1 + C) * H_pad * W_pad * 4            # gmm + wsum accumulators
    block_bytes = 2 * 2 * C * TH * W_pad * itemsize        # img + out, double-buffered
    temp_bytes = (12 + C) * TH * W_pad * 4                 # in-kernel f32 temporaries
    need = scratch_bytes + block_bytes + temp_bytes
    vmem_limit = int(min(100 * 2 ** 20, max(32 * 2 ** 20, int(need * 1.3))))

    kernel = functools.partial(
        _gmm_anomaly_kernel, C=C, K=K, H=H, W=W, TH=TH, W_pad=W_pad, padded=padded)

    # Image/output block index map returns (n, 0, p*t, 0): during the
    # accumulation pass (p==0) the block index is constant, so the image is
    # effectively only streamed (and the output only written back) during the
    # composite pass.
    img_map = lambda n, p, t: (n, 0, p * t, 0)

    out = pl.pallas_call(
        kernel,
        out_shape=jax.ShapeDtypeStruct((N, C, H_pad, W_pad), imageN.dtype),
        grid=(N, 2, n_tiles),
        in_specs=[
            pl.BlockSpec(memory_space=pltpu.MemorySpace.SMEM),      # packed params
            pl.BlockSpec((1, C, TH, W_pad), img_map),               # image tiles
        ],
        out_specs=pl.BlockSpec((1, C, TH, W_pad), img_map),
        scratch_shapes=[
            pltpu.VMEM((H_pad, W_pad), jnp.float32),                # gmm accumulator
            pltpu.VMEM((C, H_pad, W_pad), jnp.float32),             # per-channel wsum
            pltpu.VMEM((1, 1), jnp.float32),                        # running max(gmm)
        ],
        compiler_params=pltpu.CompilerParams(
            dimension_semantics=("parallel", "arbitrary", "arbitrary"),
            vmem_limit_bytes=vmem_limit),
    )(par, img)

    if padded:
        out = out[:, :, :H, :W]
    return out


# ---------------------------------------------------------------------------
# Deterministic parameter generation (= RandomGMMParameters.forward, JAX glue)
# ---------------------------------------------------------------------------
def make_gmm_params(key, N, C, K, sigma_eps=0.01, rho_eps=0.01):
    ks = jax.random.split(key, 8)
    color = jax.random.uniform(ks[0], (N, C, K)) * 2.0 - 1.0
    mu_x = jax.random.uniform(ks[1], (N, K)) * 2.0 - 1.0
    mu_y = jax.random.uniform(ks[2], (N, K)) * 2.0 - 1.0
    sigma_x = jax.nn.softplus(jax.random.normal(ks[3], (N, K))) + sigma_eps
    sigma_y = jax.nn.softplus(jax.random.normal(ks[4], (N, K))) + sigma_eps
    rho = (jax.random.uniform(ks[5], (N, K)) * 2.0 - 1.0) * (1.0 - rho_eps)
    pi = jax.nn.softmax(jax.random.normal(ks[6], (N, K)), axis=-1)
    scale = jax.random.uniform(ks[7], (N, 1))
    return color, mu_x, mu_y, sigma_x, sigma_y, rho, pi, scale


# ---------------------------------------------------------------------------
# Pure-JAX reference (mirrors GMMGenerator.forward + anomaly compositing)
# ---------------------------------------------------------------------------
def gmm_anomaly_ref(imageN, params):
    color, mu_x, mu_y, sigma_x, sigma_y, rho, pi, scale = params
    N, C, H, W = imageN.shape
    K = mu_x.shape[-1]
    x = (jnp.arange(W) / (W - 1) * 2.0 - 1.0).reshape(1, 1, 1, W, 1)
    y = (jnp.arange(H) / (H - 1) * 2.0 - 1.0).reshape(1, 1, H, 1, 1)
    r = lambda a: a.reshape(N, 1, 1, 1, K)
    z_x = (x - r(mu_x)) / r(sigma_x)
    z_y = (y - r(mu_y)) / r(sigma_y)
    rho5 = r(rho)
    f = jnp.exp(-(z_x * z_x - 2.0 * rho5 * z_x * z_y + z_y * z_y)
                / (2.0 * (1.0 - rho5 * rho5)))
    gauss = f * r(pi)                                        # (N,1,H,W,K)
    gmm = gauss.sum(-1)                                      # (N,1,H,W)
    gmax = gmm.reshape(N, -1).max(-1).reshape(N, 1, 1, 1, 1)
    norm = gauss / gmax * scale.reshape(N, 1, 1, 1, 1)
    mask = 1.0 - norm.sum(-1)                                # (N,1,H,W)
    noise = (norm * color.reshape(N, C, 1, 1, K)).sum(-1)    # (N,C,H,W)
    return imageN * mask + noise


if __name__ == "__main__":
    key = jax.random.PRNGKey(0)

    # Module spec sizes: args.nc = 4 channels, args.K = 8 mixture components.
    N, C, H, W, K = 2, 4, 16, 16, 8
    k_img, k_par = jax.random.split(key)
    imageN = jax.random.normal(k_img, (N, C, H, W), dtype=jnp.float32)
    params = make_gmm_params(k_par, N, C, K)

    out = jax.block_until_ready(gmm_anomaly_pallas(imageN, params))
    ref = gmm_anomaly_ref(imageN, params)
    assert out.shape == (N, C, H, W)
    assert jnp.allclose(out, ref, rtol=1e-4, atol=1e-4), "mismatch vs reference"

    # Exercise the multi-tile + padded path (W not a multiple of 128, H not a
    # multiple of the tile height) to validate the two-pass tiling and masking.
    N2, C2, H2, W2, K2 = 2, 4, 40, 72, 8
    k_img2, k_par2 = jax.random.split(jax.random.PRNGKey(1))
    image2 = jax.random.normal(k_img2, (N2, C2, H2, W2), dtype=jnp.float32)
    params2 = make_gmm_params(k_par2, N2, C2, K2)

    out2 = jax.block_until_ready(
        gmm_anomaly_pallas(image2, params2, rows_per_tile=8))
    ref2 = gmm_anomaly_ref(image2, params2)
    assert out2.shape == (N2, C2, H2, W2)
    assert jnp.allclose(out2, ref2, rtol=1e-4, atol=1e-4), "mismatch vs reference (tiled)"

    print("KERNEL_OK")
</pallas_src>

<mosaic_0001>
module attributes {stable_mosaic.version = 11 : i64} {
  func.func @_gmm_anomaly_kernel(%arg0: i32, %arg1: i32, %arg2: i32, %arg3: memref<2x81xf32, #tpu.memory_space<smem>>, %arg4: memref<1x4x16x128xf32, #tpu.memory_space<vmem>>, %arg5: memref<1x4x16x128xf32, #tpu.memory_space<vmem>>, %arg6: memref<16x128xf32, #tpu.memory_space<vmem>>, %arg7: memref<4x16x128xf32, #tpu.memory_space<vmem>>, %arg8: memref<1x1xf32, #tpu.memory_space<vmem>>) attributes {dimension_semantics = [#tpu.dimension_semantics<parallel>, #tpu.dimension_semantics<arbitrary>, #tpu.dimension_semantics<arbitrary>], iteration_bounds = array<i64: 2, 2, 1>, scalar_prefetch = 0 : i64, scratch_operands = 3 : i64, tpu.core_type = #tpu.core_type<tc>, window_params = [{transform_indices = @transform_0, window_bounds = array<i64: 2, 81>}, {transform_indices = @transform_1, window_bounds = array<i64: 1, 4, 16, 128>}, {transform_indices = @transform_2, window_bounds = array<i64: 1, 4, 16, 128>}]} {
    %c16_i32 = arith.constant 16 : i32
    %0 = arith.muli %arg2, %c16_i32 : i32
    %1 = tpu.assume_multiple %0, 16 : i32
    %c0_i32 = arith.constant 0 : i32
    %2 = arith.cmpi eq, %arg1, %c0_i32 : i32
    %3 = arith.extui %2 : i1 to i32
    %c0_i32_0 = arith.constant 0 : i32
    %4 = arith.cmpi ne, %3, %c0_i32_0 : i32
    scf.if %4 {
      %8 = tpu.iota {dimensions = array<i32: 0>} : vector<16x128xi32>
      %c16_i32_2 = arith.constant 16 : i32
      %9 = arith.muli %arg2, %c16_i32_2 : i32
      %10 = vector.broadcast %9 : i32 to vector<16x128xi32>
      %11 = arith.addi %8, %10 : vector<16x128xi32>
      %12 = tpu.iota {dimensions = array<i32: 1>} : vector<16x128xi32>
      %13 = arith.sitofp %11 : vector<16x128xi32> to vector<16x128xf32>
      %cst = arith.constant 0.13333334 : f32
      %14 = vector.broadcast %cst : f32 to vector<16x128xf32>
      %15 = arith.mulf %13, %14 : vector<16x128xf32>
      %cst_3 = arith.constant 1.000000e+00 : f32
      %16 = vector.broadcast %cst_3 : f32 to vector<16x128xf32>
      %17 = arith.subf %15, %16 : vector<16x128xf32>
      %18 = arith.sitofp %12 : vector<16x128xi32> to vector<16x128xf32>
      %cst_4 = arith.constant 0.13333334 : f32
      %19 = vector.broadcast %cst_4 : f32 to vector<16x128xf32>
      %20 = arith.mulf %18, %19 : vector<16x128xf32>
      %cst_5 = arith.constant 1.000000e+00 : f32
      %21 = vector.broadcast %cst_5 : f32 to vector<16x128xf32>
      %22 = arith.subf %20, %21 : vector<16x128xf32>
      %cst_6 = arith.constant 0.000000e+00 : f32
      %23 = vector.broadcast %cst_6 : f32 to vector<16x128xf32>
      %cst_7 = arith.constant 0.000000e+00 : f32
      %24 = vector.broadcast %cst_7 : f32 to vector<16x128xf32>
      %cst_8 = arith.constant 0.000000e+00 : f32
      %25 = vector.broadcast %cst_8 : f32 to vector<16x128xf32>
      %cst_9 = arith.constant 0.000000e+00 : f32
      %26 = vector.broadcast %cst_9 : f32 to vector<16x128xf32>
      %cst_10 = arith.constant 0.000000e+00 : f32
      %27 = vector.broadcast %cst_10 : f32 to vector<16x128xf32>
      %28 = arith.index_cast %arg0 : i32 to index
      %c16 = arith.constant 16 : index
      %29 = memref.load %arg3[%28, %c16] : memref<2x81xf32, #tpu.memory_space<smem>>
      %30 = vector.broadcast %29 : f32 to vector<16x128xf32>
      %31 = arith.subf %22, %30 : vector<16x128xf32>
      %32 = arith.index_cast %arg0 : i32 to index
      %c0 = arith.constant 0 : index
      %33 = memref.load %arg3[%32, %c0] : memref<2x81xf32, #tpu.memory_space<smem>>
      %34 = vector.broadcast %33 : f32 to vector<16x128xf32>
      %35 = arith.mulf %31, %34 : vector<16x128xf32>
      %36 = arith.index_cast %arg0 : i32 to index
      %c24 = arith.constant 24 : index
      %37 = memref.load %arg3[%36, %c24] : memref<2x81xf32, #tpu.memory_space<smem>>
      %38 = vector.broadcast %37 : f32 to vector<16x128xf32>
      %39 = arith.subf %17, %38 : vector<16x128xf32>
      %40 = arith.index_cast %arg0 : i32 to index
      %c8 = arith.constant 8 : index
      %41 = memref.load %arg3[%40, %c8] : memref<2x81xf32, #tpu.memory_space<smem>>
      %42 = vector.broadcast %41 : f32 to vector<16x128xf32>
      %43 = arith.mulf %39, %42 : vector<16x128xf32>
      %44 = arith.index_cast %arg0 : i32 to index
      %c32 = arith.constant 32 : index
      %45 = memref.load %arg3[%44, %c32] : memref<2x81xf32, #tpu.memory_space<smem>>
      %46 = arith.index_cast %arg0 : i32 to index
      %c40 = arith.constant 40 : index
      %47 = memref.load %arg3[%46, %c40] : memref<2x81xf32, #tpu.memory_space<smem>>
      %48 = arith.mulf %35, %35 : vector<16x128xf32>
      %49 = arith.mulf %43, %43 : vector<16x128xf32>
      %50 = arith.addf %48, %49 : vector<16x128xf32>
      %cst_11 = arith.constant 2.000000e+00 : f32
      %51 = arith.mulf %cst_11, %45 : f32
      %52 = arith.mulf %35, %43 : vector<16x128xf32>
      %53 = vector.broadcast %51 : f32 to vector<16x128xf32>
      %54 = arith.mulf %53, %52 : vector<16x128xf32>
      %55 = arith.subf %50, %54 : vector<16x128xf32>
      %56 = vector.broadcast %47 : f32 to vector<16x128xf32>
      %57 = arith.subf %56, %55 : vector<16x128xf32>
      %58 = math.exp %57 : vector<16x128xf32>
      %59 = arith.addf %23, %58 : vector<16x128xf32>
      %60 = arith.index_cast %arg0 : i32 to index
      %c48 = arith.constant 48 : index
      %61 = memref.load %arg3[%60, %c48] : memref<2x81xf32, #tpu.memory_space<smem>>
      %62 = vector.broadcast %61 : f32 to vector<16x128xf32>
      %63 = arith.mulf %58, %62 : vector<16x128xf32>
      %64 = arith.addf %24, %63 : vector<16x128xf32>
      %65 = arith.index_cast %arg0 : i32 to index
      %c56 = arith.constant 56 : index
      %66 = memref.load %arg3[%65, %c56] : memref<2x81xf32, #tpu.memory_space<smem>>
      %67 = vector.broadcast %66 : f32 to vector<16x128xf32>
      %68 = arith.mulf %58, %67 : vector<16x128xf32>
      %69 = arith.addf %25, %68 : vector<16x128xf32>
      %70 = arith.index_cast %arg0 : i32 to index
      %c64 = arith.constant 64 : index
      %71 = memref.load %arg3[%70, %c64] : memref<2x81xf32, #tpu.memory_space<smem>>
      %72 = vector.broadcast %71 : f32 to vector<16x128xf32>
      %73 = arith.mulf %58, %72 : vector<16x128xf32>
      %74 = arith.addf %26, %73 : vector<16x128xf32>
      %75 = arith.index_cast %arg0 : i32 to index
      %c72 = arith.constant 72 : index
      %76 = memref.load %arg3[%75, %c72] : memref<2x81xf32, #tpu.memory_space<smem>>
      %77 = vector.broadcast %76 : f32 to vector<16x128xf32>
      %78 = arith.mulf %58, %77 : vector<16x128xf32>
      %79 = arith.addf %27, %78 : vector<16x128xf32>
      %80 = arith.index_cast %arg0 : i32 to index
      %c17 = arith.constant 17 : index
      %81 = memref.load %arg3[%80, %c17] : memref<2x81xf32, #tpu.memory_space<smem>>
      %82 = vector.broadcast %81 : f32 to vector<16x128xf32>
      %83 = arith.subf %22, %82 : vector<16x128xf32>
      %84 = arith.index_cast %arg0 : i32 to index
      %c1 = arith.constant 1 : index
      %85 = memref.load %arg3[%84, %c1] : memref<2x81xf32, #tpu.memory_space<smem>>
      %86 = vector.broadcast %85 : f32 to vector<16x128xf32>
      %87 = arith.mulf %83, %86 : vector<16x128xf32>
      %88 = arith.index_cast %arg0 : i32 to index
      %c25 = arith.constant 25 : index
      %89 = memref.load %arg3[%88, %c25] : memref<2x81xf32, #tpu.memory_space<smem>>
      %90 = vector.broadcast %89 : f32 to vector<16x128xf32>
      %91 = arith.subf %17, %90 : vector<16x128xf32>
      %92 = arith.index_cast %arg0 : i32 to index
      %c9 = arith.constant 9 : index
      %93 = memref.load %arg3[%92, %c9] : memref<2x81xf32, #tpu.memory_space<smem>>
      %94 = vector.broadcast %93 : f32 to vector<16x128xf32>
      %95 = arith.mulf %91, %94 : vector<16x128xf32>
      %96 = arith.index_cast %arg0 : i32 to index
      %c33 = arith.constant 33 : index
      %97 = memref.load %arg3[%96, %c33] : memref<2x81xf32, #tpu.memory_space<smem>>
      %98 = arith.index_cast %arg0 : i32 to index
      %c41 = arith.constant 41 : index
      %99 = memref.load %arg3[%98, %c41] : memref<2x81xf32, #tpu.memory_space<smem>>
      %100 = arith.mulf %87, %87 : vector<16x128xf32>
      %101 = arith.mulf %95, %95 : vector<16x128xf32>
      %102 = arith.addf %100, %101 : vector<16x128xf32>
      %cst_12 = arith.constant 2.000000e+00 : f32
      %103 = arith.mulf %cst_12, %97 : f32
      %104 = arith.mulf %87, %95 : vector<16x128xf32>
      %105 = vector.broadcast %103 : f32 to vector<16x128xf32>
      %106 = arith.mulf %105, %104 : vector<16x128xf32>
      %107 = arith.subf %102, %106 : vector<16x128xf32>
      %108 = vector.broadcast %99 : f32 to vector<16x128xf32>
      %109 = arith.subf %108, %107 : vector<16x128xf32>
      %110 = math.exp %109 : vector<16x128xf32>
      %111 = arith.addf %59, %110 : vector<16x128xf32>
      %112 = arith.index_cast %arg0 : i32 to index
      %c49 = arith.constant 49 : index
      %113 = memref.load %arg3[%112, %c49] : memref<2x81xf32, #tpu.memory_space<smem>>
      %114 = vector.broadcast %113 : f32 to vector<16x128xf32>
      %115 = arith.mulf %110, %114 : vector<16x128xf32>
      %116 = arith.addf %64, %115 : vector<16x128xf32>
      %117 = arith.index_cast %arg0 : i32 to index
      %c57 = arith.constant 57 : index
      %118 = memref.load %arg3[%117, %c57] : memref<2x81xf32, #tpu.memory_space<smem>>
      %119 = vector.broadcast %118 : f32 to vector<16x128xf32>
      %120 = arith.mulf %110, %119 : vector<16x128xf32>
      %121 = arith.addf %69, %120 : vector<16x128xf32>
      %122 = arith.index_cast %arg0 : i32 to index
      %c65 = arith.constant 65 : index
      %123 = memref.load %arg3[%122, %c65] : memref<2x81xf32, #tpu.memory_space<smem>>
      %124 = vector.broadcast %123 : f32 to vector<16x128xf32>
      %125 = arith.mulf %110, %124 : vector<16x128xf32>
      %126 = arith.addf %74, %125 : vector<16x128xf32>
      %127 = arith.index_cast %arg0 : i32 to index
      %c73 = arith.constant 73 : index
      %128 = memref.load %arg3[%127, %c73] : memref<2x81xf32, #tpu.memory_space<smem>>
      %129 = vector.broadcast %128 : f32 to vector<16x128xf32>
      %130 = arith.mulf %110, %129 : vector<16x128xf32>
      %131 = arith.addf %79, %130 : vector<16x128xf32>
      %132 = arith.index_cast %arg0 : i32 to index
      %c18 = arith.constant 18 : index
      %133 = memref.load %arg3[%132, %c18] : memref<2x81xf32, #tpu.memory_space<smem>>
      %134 = vector.broadcast %133 : f32 to vector<16x128xf32>
      %135 = arith.subf %22, %134 : vector<16x128xf32>
      %136 = arith.index_cast %arg0 : i32 to index
      %c2 = arith.constant 2 : index
      %137 = memref.load %arg3[%136, %c2] : memref<2x81xf32, #tpu.memory_space<smem>>
      %138 = vector.broadcast %137 : f32 to vector<16x128xf32>
      %139 = arith.mulf %135, %138 : vector<16x128xf32>
      %140 = arith.index_cast %arg0 : i32 to index
      %c26 = arith.constant 26 : index
      %141 = memref.load %arg3[%140, %c26] : memref<2x81xf32, #tpu.memory_space<smem>>
      %142 = vector.broadcast %141 : f32 to vector<16x128xf32>
      %143 = arith.subf %17, %142 : vector<16x128xf32>
      %144 = arith.index_cast %arg0 : i32 to index
      %c10 = arith.constant 10 : index
      %145 = memref.load %arg3[%144, %c10] : memref<2x81xf32, #tpu.memory_space<smem>>
      %146 = vector.broadcast %145 : f32 to vector<16x128xf32>
      %147 = arith.mulf %143, %146 : vector<16x128xf32>
      %148 = arith.index_cast %arg0 : i32 to index
      %c34 = arith.constant 34 : index
      %149 = memref.load %arg3[%148, %c34] : memref<2x81xf32, #tpu.memory_space<smem>>
      %150 = arith.index_cast %arg0 : i32 to index
      %c42 = arith.constant 42 : index
      %151 = memref.load %arg3[%150, %c42] : memref<2x81xf32, #tpu.memory_space<smem>>
      %152 = arith.mulf %139, %139 : vector<16x128xf32>
      %153 = arith.mulf %147, %147 : vector<16x128xf32>
      %154 = arith.addf %152, %153 : vector<16x128xf32>
      %cst_13 = arith.constant 2.000000e+00 : f32
      %155 = arith.mulf %cst_13, %149 : f32
      %156 = arith.mulf %139, %147 : vector<16x128xf32>
      %157 = vector.broadcast %155 : f32 to vector<16x128xf32>
      %158 = arith.mulf %157, %156 : vector<16x128xf32>
      %159 = arith.subf %154, %158 : vector<16x128xf32>
      %160 = vector.broadcast %151 : f32 to vector<16x128xf32>
      %161 = arith.subf %160, %159 : vector<16x128xf32>
      %162 = math.exp %161 : vector<16x128xf32>
      %163 = arith.addf %111, %162 : vector<16x128xf32>
      %164 = arith.index_cast %arg0 : i32 to index
      %c50 = arith.constant 50 : index
      %165 = memref.load %arg3[%164, %c50] : memref<2x81xf32, #tpu.memory_space<smem>>
      %166 = vector.broadcast %165 : f32 to vector<16x128xf32>
      %167 = arith.mulf %162, %166 : vector<16x128xf32>
      %168 = arith.addf %116, %167 : vector<16x128xf32>
      %169 = arith.index_cast %arg0 : i32 to index
      %c58 = arith.constant 58 : index
      %170 = memref.load %arg3[%169, %c58] : memref<2x81xf32, #tpu.memory_space<smem>>
      %171 = vector.broadcast %170 : f32 to vector<16x128xf32>
      %172 = arith.mulf %162, %171 : vector<16x128xf32>
      %173 = arith.addf %121, %172 : vector<16x128xf32>
      %174 = arith.index_cast %arg0 : i32 to index
      %c66 = arith.constant 66 : index
      %175 = memref.load %arg3[%174, %c66] : memref<2x81xf32, #tpu.memory_space<smem>>
      %176 = vector.broadcast %175 : f32 to vector<16x128xf32>
      %177 = arith.mulf %162, %176 : vector<16x128xf32>
      %178 = arith.addf %126, %177 : vector<16x128xf32>
      %179 = arith.index_cast %arg0 : i32 to index
      %c74 = arith.constant 74 : index
      %180 = memref.load %arg3[%179, %c74] : memref<2x81xf32, #tpu.memory_space<smem>>
      %181 = vector.broadcast %180 : f32 to vector<16x128xf32>
      %182 = arith.mulf %162, %181 : vector<16x128xf32>
      %183 = arith.addf %131, %182 : vector<16x128xf32>
      %184 = arith.index_cast %arg0 : i32 to index
      %c19 = arith.constant 19 : index
      %185 = memref.load %arg3[%184, %c19] : memref<2x81xf32, #tpu.memory_space<smem>>
      %186 = vector.broadcast %185 : f32 to vector<16x128xf32>
      %187 = arith.subf %22, %186 : vector<16x128xf32>
      %188 = arith.index_cast %arg0 : i32 to index
      %c3 = arith.constant 3 : index
      %189 = memref.load %arg3[%188, %c3] : memref<2x81xf32, #tpu.memory_space<smem>>
      %190 = vector.broadcast %189 : f32 to vector<16x128xf32>
      %191 = arith.mulf %187, %190 : vector<16x128xf32>
      %192 = arith.index_cast %arg0 : i32 to index
      %c27 = arith.constant 27 : index
      %193 = memref.load %arg3[%192, %c27] : memref<2x81xf32, #tpu.memory_space<smem>>
      %194 = vector.broadcast %193 : f32 to vector<16x128xf32>
      %195 = arith.subf %17, %194 : vector<16x128xf32>
      %196 = arith.index_cast %arg0 : i32 to index
      %c11 = arith.constant 11 : index
      %197 = memref.load %arg3[%196, %c11] : memref<2x81xf32, #tpu.memory_space<smem>>
      %198 = vector.broadcast %197 : f32 to vector<16x128xf32>
      %199 = arith.mulf %195, %198 : vector<16x128xf32>
      %200 = arith.index_cast %arg0 : i32 to index
      %c35 = arith.constant 35 : index
      %201 = memref.load %arg3[%200, %c35] : memref<2x81xf32, #tpu.memory_space<smem>>
      %202 = arith.index_cast %arg0 : i32 to index
      %c43 = arith.constant 43 : index
      %203 = memref.load %arg3[%202, %c43] : memref<2x81xf32, #tpu.memory_space<smem>>
      %204 = arith.mulf %191, %191 : vector<16x128xf32>
      %205 = arith.mulf %199, %199 : vector<16x128xf32>
      %206 = arith.addf %204, %205 : vector<16x128xf32>
      %cst_14 = arith.constant 2.000000e+00 : f32
      %207 = arith.mulf %cst_14, %201 : f32
      %208 = arith.mulf %191, %199 : vector<16x128xf32>
      %209 = vector.broadcast %207 : f32 to vector<16x128xf32>
      %210 = arith.mulf %209, %208 : vector<16x128xf32>
      %211 = arith.subf %206, %210 : vector<16x128xf32>
      %212 = vector.broadcast %203 : f32 to vector<16x128xf32>
      %213 = arith.subf %212, %211 : vector<16x128xf32>
      %214 = math.exp %213 : vector<16x128xf32>
      %215 = arith.addf %163, %214 : vector<16x128xf32>
      %216 = arith.index_cast %arg0 : i32 to index
      %c51 = arith.constant 51 : index
      %217 = memref.load %arg3[%216, %c51] : memref<2x81xf32, #tpu.memory_space<smem>>
      %218 = vector.broadcast %217 : f32 to vector<16x128xf32>
      %219 = arith.mulf %214, %218 : vector<16x128xf32>
      %220 = arith.addf %168, %219 : vector<16x128xf32>
      %221 = arith.index_cast %arg0 : i32 to index
      %c59 = arith.constant 59 : index
      %222 = memref.load %arg3[%221, %c59] : memref<2x81xf32, #tpu.memory_space<smem>>
      %223 = vector.broadcast %222 : f32 to vector<16x128xf32>
      %224 = arith.mulf %214, %223 : vector<16x128xf32>
      %225 = arith.addf %173, %224 : vector<16x128xf32>
      %226 = arith.index_cast %arg0 : i32 to index
      %c67 = arith.constant 67 : index
      %227 = memref.load %arg3[%226, %c67] : memref<2x81xf32, #tpu.memory_space<smem>>
      %228 = vector.broadcast %227 : f32 to vector<16x128xf32>
      %229 = arith.mulf %214, %228 : vector<16x128xf32>
      %230 = arith.addf %178, %229 : vector<16x128xf32>
      %231 = arith.index_cast %arg0 : i32 to index
      %c75 = arith.constant 75 : index
      %232 = memref.load %arg3[%231, %c75] : memref<2x81xf32, #tpu.memory_space<smem>>
      %233 = vector.broadcast %232 : f32 to vector<16x128xf32>
      %234 = arith.mulf %214, %233 : vector<16x128xf32>
      %235 = arith.addf %183, %234 : vector<16x128xf32>
      %236 = arith.index_cast %arg0 : i32 to index
      %c20 = arith.constant 20 : index
      %237 = memref.load %arg3[%236, %c20] : memref<2x81xf32, #tpu.memory_space<smem>>
      %238 = vector.broadcast %237 : f32 to vector<16x128xf32>
      %239 = arith.subf %22, %238 : vector<16x128xf32>
      %240 = arith.index_cast %arg0 : i32 to index
      %c4 = arith.constant 4 : index
      %241 = memref.load %arg3[%240, %c4] : memref<2x81xf32, #tpu.memory_space<smem>>
      %242 = vector.broadcast %241 : f32 to vector<16x128xf32>
      %243 = arith.mulf %239, %242 : vector<16x128xf32>
      %244 = arith.index_cast %arg0 : i32 to index
      %c28 = arith.constant 28 : index
      %245 = memref.load %arg3[%244, %c28] : memref<2x81xf32, #tpu.memory_space<smem>>
      %246 = vector.broadcast %245 : f32 to vector<16x128xf32>
      %247 = arith.subf %17, %246 : vector<16x128xf32>
      %248 = arith.index_cast %arg0 : i32 to index
      %c12 = arith.constant 12 : index
      %249 = memref.load %arg3[%248, %c12] : memref<2x81xf32, #tpu.memory_space<smem>>
      %250 = vector.broadcast %249 : f32 to vector<16x128xf32>
      %251 = arith.mulf %247, %250 : vector<16x128xf32>
      %252 = arith.index_cast %arg0 : i32 to index
      %c36 = arith.constant 36 : index
      %253 = memref.load %arg3[%252, %c36] : memref<2x81xf32, #tpu.memory_space<smem>>
      %254 = arith.index_cast %arg0 : i32 to index
      %c44 = arith.constant 44 : index
      %255 = memref.load %arg3[%254, %c44] : memref<2x81xf32, #tpu.memory_space<smem>>
      %256 = arith.mulf %243, %243 : vector<16x128xf32>
      %257 = arith.mulf %251, %251 : vector<16x128xf32>
      %258 = arith.addf %256, %257 : vector<16x128xf32>
      %cst_15 = arith.constant 2.000000e+00 : f32
      %259 = arith.mulf %cst_15, %253 : f32
      %260 = arith.mulf %243, %251 : vector<16x128xf32>
      %261 = vector.broadcast %259 : f32 to vector<16x128xf32>
      %262 = arith.mulf %261, %260 : vector<16x128xf32>
      %263 = arith.subf %258, %262 : vector<16x128xf32>
      %264 = vector.broadcast %255 : f32 to vector<16x128xf32>
      %265 = arith.subf %264, %263 : vector<16x128xf32>
      %266 = math.exp %265 : vector<16x128xf32>
      %267 = arith.addf %215, %266 : vector<16x128xf32>
      %268 = arith.index_cast %arg0 : i32 to index
      %c52 = arith.constant 52 : index
      %269 = memref.load %arg3[%268, %c52] : memref<2x81xf32, #tpu.memory_space<smem>>
      %270 = vector.broadcast %269 : f32 to vector<16x128xf32>
      %271 = arith.mulf %266, %270 : vector<16x128xf32>
      %272 = arith.addf %220, %271 : vector<16x128xf32>
      %273 = arith.index_cast %arg0 : i32 to index
      %c60 = arith.constant 60 : index
      %274 = memref.load %arg3[%273, %c60] : memref<2x81xf32, #tpu.memory_space<smem>>
      %275 = vector.broadcast %274 : f32 to vector<16x128xf32>
      %276 = arith.mulf %266, %275 : vector<16x128xf32>
      %277 = arith.addf %225, %276 : vector<16x128xf32>
      %278 = arith.index_cast %arg0 : i32 to index
      %c68 = arith.constant 68 : index
      %279 = memref.load %arg3[%278, %c68] : memref<2x81xf32, #tpu.memory_space<smem>>
      %280 = vector.broadcast %279 : f32 to vector<16x128xf32>
      %281 = arith.mulf %266, %280 : vector<16x128xf32>
      %282 = arith.addf %230, %281 : vector<16x128xf32>
      %283 = arith.index_cast %arg0 : i32 to index
      %c76 = arith.constant 76 : index
      %284 = memref.load %arg3[%283, %c76] : memref<2x81xf32, #tpu.memory_space<smem>>
      %285 = vector.broadcast %284 : f32 to vector<16x128xf32>
      %286 = arith.mulf %266, %285 : vector<16x128xf32>
      %287 = arith.addf %235, %286 : vector<16x128xf32>
      %288 = arith.index_cast %arg0 : i32 to index
      %c21 = arith.constant 21 : index
      %289 = memref.load %arg3[%288, %c21] : memref<2x81xf32, #tpu.memory_space<smem>>
      %290 = vector.broadcast %289 : f32 to vector<16x128xf32>
      %291 = arith.subf %22, %290 : vector<16x128xf32>
      %292 = arith.index_cast %arg0 : i32 to index
      %c5 = arith.constant 5 : index
      %293 = memref.load %arg3[%292, %c5] : memref<2x81xf32, #tpu.memory_space<smem>>
      %294 = vector.broadcast %293 : f32 to vector<16x128xf32>
      %295 = arith.mulf %291, %294 : vector<16x128xf32>
      %296 = arith.index_cast %arg0 : i32 to index
      %c29 = arith.constant 29 : index
      %297 = memref.load %arg3[%296, %c29] : memref<2x81xf32, #tpu.memory_space<smem>>
      %298 = vector.broadcast %297 : f32 to vector<16x128xf32>
      %299 = arith.subf %17, %298 : vector<16x128xf32>
      %300 = arith.index_cast %arg0 : i32 to index
      %c13 = arith.constant 13 : index
      %301 = memref.load %arg3[%300, %c13] : memref<2x81xf32, #tpu.memory_space<smem>>
      %302 = vector.broadcast %301 : f32 to vector<16x128xf32>
      %303 = arith.mulf %299, %302 : vector<16x128xf32>
      %304 = arith.index_cast %arg0 : i32 to index
      %c37 = arith.constant 37 : index
      %305 = memref.load %arg3[%304, %c37] : memref<2x81xf32, #tpu.memory_space<smem>>
      %306 = arith.index_cast %arg0 : i32 to index
      %c45 = arith.constant 45 : index
      %307 = memref.load %arg3[%306, %c45] : memref<2x81xf32, #tpu.memory_space<smem>>
      %308 = arith.mulf %295, %295 : vector<16x128xf32>
      %309 = arith.mulf %303, %303 : vector<16x128xf32>
      %310 = arith.addf %308, %309 : vector<16x128xf32>
      %cst_16 = arith.constant 2.000000e+00 : f32
      %311 = arith.mulf %cst_16, %305 : f32
      %312 = arith.mulf %295, %303 : vector<16x128xf32>
      %313 = vector.broadcast %311 : f32 to vector<16x128xf32>
      %314 = arith.mulf %313, %312 : vector<16x128xf32>
      %315 = arith.subf %310, %314 : vector<16x128xf32>
      %316 = vector.broadcast %307 : f32 to vector<16x128xf32>
      %317 = arith.subf %316, %315 : vector<16x128xf32>
      %318 = math.exp %317 : vector<16x128xf32>
      %319 = arith.addf %267, %318 : vector<16x128xf32>
      %320 = arith.index_cast %arg0 : i32 to index
      %c53 = arith.constant 53 : index
      %321 = memref.load %arg3[%320, %c53] : memref<2x81xf32, #tpu.memory_space<smem>>
      %322 = vector.broadcast %321 : f32 to vector<16x128xf32>
      %323 = arith.mulf %318, %322 : vector<16x128xf32>
      %324 = arith.addf %272, %323 : vector<16x128xf32>
      %325 = arith.index_cast %arg0 : i32 to index
      %c61 = arith.constant 61 : index
      %326 = memref.load %arg3[%325, %c61] : memref<2x81xf32, #tpu.memory_space<smem>>
      %327 = vector.broadcast %326 : f32 to vector<16x128xf32>
      %328 = arith.mulf %318, %327 : vector<16x128xf32>
      %329 = arith.addf %277, %328 : vector<16x128xf32>
      %330 = arith.index_cast %arg0 : i32 to index
      %c69 = arith.constant 69 : index
      %331 = memref.load %arg3[%330, %c69] : memref<2x81xf32, #tpu.memory_space<smem>>
      %332 = vector.broadcast %331 : f32 to vector<16x128xf32>
      %333 = arith.mulf %318, %332 : vector<16x128xf32>
      %334 = arith.addf %282, %333 : vector<16x128xf32>
      %335 = arith.index_cast %arg0 : i32 to index
      %c77 = arith.constant 77 : index
      %336 = memref.load %arg3[%335, %c77] : memref<2x81xf32, #tpu.memory_space<smem>>
      %337 = vector.broadcast %336 : f32 to vector<16x128xf32>
      %338 = arith.mulf %318, %337 : vector<16x128xf32>
      %339 = arith.addf %287, %338 : vector<16x128xf32>
      %340 = arith.index_cast %arg0 : i32 to index
      %c22 = arith.constant 22 : index
      %341 = memref.load %arg3[%340, %c22] : memref<2x81xf32, #tpu.memory_space<smem>>
      %342 = vector.broadcast %341 : f32 to vector<16x128xf32>
      %343 = arith.subf %22, %342 : vector<16x128xf32>
      %344 = arith.index_cast %arg0 : i32 to index
      %c6 = arith.constant 6 : index
      %345 = memref.load %arg3[%344, %c6] : memref<2x81xf32, #tpu.memory_space<smem>>
      %346 = vector.broadcast %345 : f32 to vector<16x128xf32>
      %347 = arith.mulf %343, %346 : vector<16x128xf32>
      %348 = arith.index_cast %arg0 : i32 to index
      %c30 = arith.constant 30 : index
      %349 = memref.load %arg3[%348, %c30] : memref<2x81xf32, #tpu.memory_space<smem>>
      %350 = vector.broadcast %349 : f32 to vector<16x128xf32>
      %351 = arith.subf %17, %350 : vector<16x128xf32>
      %352 = arith.index_cast %arg0 : i32 to index
      %c14 = arith.constant 14 : index
      %353 = memref.load %arg3[%352, %c14] : memref<2x81xf32, #tpu.memory_space<smem>>
      %354 = vector.broadcast %353 : f32 to vector<16x128xf32>
      %355 = arith.mulf %351, %354 : vector<16x128xf32>
      %356 = arith.index_cast %arg0 : i32 to index
      %c38 = arith.constant 38 : index
      %357 = memref.load %arg3[%356, %c38] : memref<2x81xf32, #tpu.memory_space<smem>>
      %358 = arith.index_cast %arg0 : i32 to index
      %c46 = arith.constant 46 : index
      %359 = memref.load %arg3[%358, %c46] : memref<2x81xf32, #tpu.memory_space<smem>>
      %360 = arith.mulf %347, %347 : vector<16x128xf32>
      %361 = arith.mulf %355, %355 : vector<16x128xf32>
      %362 = arith.addf %360, %361 : vector<16x128xf32>
      %cst_17 = arith.constant 2.000000e+00 : f32
      %363 = arith.mulf %cst_17, %357 : f32
      %364 = arith.mulf %347, %355 : vector<16x128xf32>
      %365 = vector.broadcast %363 : f32 to vector<16x128xf32>
      %366 = arith.mulf %365, %364 : vector<16x128xf32>
      %367 = arith.subf %362, %366 : vector<16x128xf32>
      %368 = vector.broadcast %359 : f32 to vector<16x128xf32>
      %369 = arith.subf %368, %367 : vector<16x128xf32>
      %370 = math.exp %369 : vector<16x128xf32>
      %371 = arith.addf %319, %370 : vector<16x128xf32>
      %372 = arith.index_cast %arg0 : i32 to index
      %c54 = arith.constant 54 : index
      %373 = memref.load %arg3[%372, %c54] : memref<2x81xf32, #tpu.memory_space<smem>>
      %374 = vector.broadcast %373 : f32 to vector<16x128xf32>
      %375 = arith.mulf %370, %374 : vector<16x128xf32>
      %376 = arith.addf %324, %375 : vector<16x128xf32>
      %377 = arith.index_cast %arg0 : i32 to index
      %c62 = arith.constant 62 : index
      %378 = memref.load %arg3[%377, %c62] : memref<2x81xf32, #tpu.memory_space<smem>>
      %379 = vector.broadcast %378 : f32 to vector<16x128xf32>
      %380 = arith.mulf %370, %379 : vector<16x128xf32>
      %381 = arith.addf %329, %380 : vector<16x128xf32>
      %382 = arith.index_cast %arg0 : i32 to index
      %c70 = arith.constant 70 : index
      %383 = memref.load %arg3[%382, %c70] : memref<2x81xf32, #tpu.memory_space<smem>>
      %384 = vector.broadcast %383 : f32 to vector<16x128xf32>
      %385 = arith.mulf %370, %384 : vector<16x128xf32>
      %386 = arith.addf %334, %385 : vector<16x128xf32>
      %387 = arith.index_cast %arg0 : i32 to index
      %c78 = arith.constant 78 : index
      %388 = memref.load %arg3[%387, %c78] : memref<2x81xf32, #tpu.memory_space<smem>>
      %389 = vector.broadcast %388 : f32 to vector<16x128xf32>
      %390 = arith.mulf %370, %389 : vector<16x128xf32>
      %391 = arith.addf %339, %390 : vector<16x128xf32>
      %392 = arith.index_cast %arg0 : i32 to index
      %c23 = arith.constant 23 : index
      %393 = memref.load %arg3[%392, %c23] : memref<2x81xf32, #tpu.memory_space<smem>>
      %394 = vector.broadcast %393 : f32 to vector<16x128xf32>
      %395 = arith.subf %22, %394 : vector<16x128xf32>
      %396 = arith.index_cast %arg0 : i32 to index
      %c7 = arith.constant 7 : index
      %397 = memref.load %arg3[%396, %c7] : memref<2x81xf32, #tpu.memory_space<smem>>
      %398 = vector.broadcast %397 : f32 to vector<16x128xf32>
      %399 = arith.mulf %395, %398 : vector<16x128xf32>
      %400 = arith.index_cast %arg0 : i32 to index
      %c31 = arith.constant 31 : index
      %401 = memref.load %arg3[%400, %c31] : memref<2x81xf32, #tpu.memory_space<smem>>
      %402 = vector.broadcast %401 : f32 to vector<16x128xf32>
      %403 = arith.subf %17, %402 : vector<16x128xf32>
      %404 = arith.index_cast %arg0 : i32 to index
      %c15 = arith.constant 15 : index
      %405 = memref.load %arg3[%404, %c15] : memref<2x81xf32, #tpu.memory_space<smem>>
      %406 = vector.broadcast %405 : f32 to vector<16x128xf32>
      %407 = arith.mulf %403, %406 : vector<16x128xf32>
      %408 = arith.index_cast %arg0 : i32 to index
      %c39 = arith.constant 39 : index
      %409 = memref.load %arg3[%408, %c39] : memref<2x81xf32, #tpu.memory_space<smem>>
      %410 = arith.index_cast %arg0 : i32 to index
      %c47 = arith.constant 47 : index
      %411 = memref.load %arg3[%410, %c47] : memref<2x81xf32, #tpu.memory_space<smem>>
      %412 = arith.mulf %399, %399 : vector<16x128xf32>
      %413 = arith.mulf %407, %407 : vector<16x128xf32>
      %414 = arith.addf %412, %413 : vector<16x128xf32>
      %cst_18 = arith.constant 2.000000e+00 : f32
      %415 = arith.mulf %cst_18, %409 : f32
      %416 = arith.mulf %399, %407 : vector<16x128xf32>
      %417 = vector.broadcast %415 : f32 to vector<16x128xf32>
      %418 = arith.mulf %417, %416 : vector<16x128xf32>
      %419 = arith.subf %414, %418 : vector<16x128xf32>
      %420 = vector.broadcast %411 : f32 to vector<16x128xf32>
      %421 = arith.subf %420, %419 : vector<16x128xf32>
      %422 = math.exp %421 : vector<16x128xf32>
      %423 = arith.addf %371, %422 : vector<16x128xf32>
      %424 = arith.index_cast %arg0 : i32 to index
      %c55 = arith.constant 55 : index
      %425 = memref.load %arg3[%424, %c55] : memref<2x81xf32, #tpu.memory_space<smem>>
      %426 = vector.broadcast %425 : f32 to vector<16x128xf32>
      %427 = arith.mulf %422, %426 : vector<16x128xf32>
      %428 = arith.addf %376, %427 : vector<16x128xf32>
      %429 = arith.index_cast %arg0 : i32 to index
      %c63 = arith.constant 63 : index
      %430 = memref.load %arg3[%429, %c63] : memref<2x81xf32, #tpu.memory_space<smem>>
      %431 = vector.broadcast %430 : f32 to vector<16x128xf32>
      %432 = arith.mulf %422, %431 : vector<16x128xf32>
      %433 = arith.addf %381, %432 : vector<16x128xf32>
      %434 = arith.index_cast %arg0 : i32 to index
      %c71 = arith.constant 71 : index
      %435 = memref.load %arg3[%434, %c71] : memref<2x81xf32, #tpu.memory_space<smem>>
      %436 = vector.broadcast %435 : f32 to vector<16x128xf32>
      %437 = arith.mulf %422, %436 : vector<16x128xf32>
      %438 = arith.addf %386, %437 : vector<16x128xf32>
      %439 = arith.index_cast %arg0 : i32 to index
      %c79 = arith.constant 79 : index
      %440 = memref.load %arg3[%439, %c79] : memref<2x81xf32, #tpu.memory_space<smem>>
      %441 = vector.broadcast %440 : f32 to vector<16x128xf32>
      %442 = arith.mulf %422, %441 : vector<16x128xf32>
      %443 = arith.addf %391, %442 : vector<16x128xf32>
      %444 = arith.index_cast %1 : i32 to index
      %c0_19 = arith.constant 0 : index
      %445 = vector.load %arg6[%444, %c0_19] : memref<16x128xf32, #tpu.memory_space<vmem>>, vector<16x128xf32>
      tpu.vector_store %arg6[%444, %c0_19], %423 {strides = array<i32>} : memref<16x128xf32, #tpu.memory_space<vmem>>, vector<16x128xf32>,
      %c0_20 = arith.constant 0 : index
      %446 = arith.index_cast %1 : i32 to index
      %c0_21 = arith.constant 0 : index
      %447 = vector.load %arg7[%c0_20, %446, %c0_21] : memref<4x16x128xf32, #tpu.memory_space<vmem>>, vector<1x16x128xf32>
      %448 = vector.shape_cast %447 : vector<1x16x128xf32> to vector<16x128xf32>
      %449 = vector.shape_cast %428 : vector<16x128xf32> to vector<1x16x128xf32>
      tpu.vector_store %arg7[%c0_20, %446, %c0_21], %449 {strides = array<i32>} : memref<4x16x128xf32, #tpu.memory_space<vmem>>, vector<1x16x128xf32>,
      %c1_22 = arith.constant 1 : index
      %450 = arith.index_cast %1 : i32 to index
      %c0_23 = arith.constant 0 : index
      %451 = vector.load %arg7[%c1_22, %450, %c0_23] : memref<4x16x128xf32, #tpu.memory_space<vmem>>, vector<1x16x128xf32>
      %452 = vector.shape_cast %451 : vector<1x16x128xf32> to vector<16x128xf32>
      %453 = vector.shape_cast %433 : vector<16x128xf32> to vector<1x16x128xf32>
      tpu.vector_store %arg7[%c1_22, %450, %c0_23], %453 {strides = array<i32>} : memref<4x16x128xf32, #tpu.memory_space<vmem>>, vector<1x16x128xf32>,
      %c2_24 = arith.constant 2 : index
      %454 = arith.index_cast %1 : i32 to index
      %c0_25 = arith.constant 0 : index
      %455 = vector.load %arg7[%c2_24, %454, %c0_25] : memref<4x16x128xf32, #tpu.memory_space<vmem>>, vector<1x16x128xf32>
      %456 = vector.shape_cast %455 : vector<1x16x128xf32> to vector<16x128xf32>
      %457 = vector.shape_cast %438 : vector<16x128xf32> to vector<1x16x128xf32>
      tpu.vector_store %arg7[%c2_24, %454, %c0_25], %457 {strides = array<i32>} : memref<4x16x128xf32, #tpu.memory_space<vmem>>, vector<1x16x128xf32>,
      %c3_26 = arith.constant 3 : index
      %458 = arith.index_cast %1 : i32 to index
      %c0_27 = arith.constant 0 : index
      %459 = vector.load %arg7[%c3_26, %458, %c0_27] : memref<4x16x128xf32, #tpu.memory_space<vmem>>, vector<1x16x128xf32>
      %460 = vector.shape_cast %459 : vector<1x16x128xf32> to vector<16x128xf32>
      %461 = vector.shape_cast %443 : vector<16x128xf32> to vector<1x16x128xf32>
      tpu.vector_store %arg7[%c3_26, %458, %c0_27], %461 {strides = array<i32>} : memref<4x16x128xf32, #tpu.memory_space<vmem>>, vector<1x16x128xf32>,
      %c16_i32_28 = arith.constant 16 : i32
      %462 = vector.broadcast %c16_i32_28 : i32 to vector<16x128xi32>
      %463 = arith.cmpi slt, %11, %462 : vector<16x128xi32>
      %c16_i32_29 = arith.constant 16 : i32
      %464 = vector.broadcast %c16_i32_29 : i32 to vector<16x128xi32>
      %465 = arith.cmpi slt, %12, %464 : vector<16x128xi32>
      %466 = arith.andi %463, %465 : vector<16x128xi1>
      %cst_30 = arith.constant 0.000000e+00 : f32
      %467 = vector.broadcast %cst_30 : f32 to vector<16x128xf32>
      %468 = arith.select %466, %423, %467 : vector<16x128xi1>, vector<16x128xf32>
      %469 = vector.shape_cast %468 : vector<16x128xf32> to vector<1x16x128xf32>
      %cst_31 = arith.constant dense<0xFF800000> : vector<1xf32>
      %470 = vector.multi_reduction <maximumf>, %469, %cst_31 [1, 2] : vector<1x16x128xf32> to vector<1xf32>
      %471 = vector.shape_cast %470 : vector<1xf32> to vector<1x1x1xf32>
      %472 = vector.extract %471[0, 0, 0] : f32 from vector<1x1x1xf32>
      %c0_i32_32 = arith.constant 0 : i32
      %473 = arith.cmpi eq, %arg2, %c0_i32_32 : i32
      %474 = arith.extui %473 : i1 to i32
      %c0_i32_33 = arith.constant 0 : i32
      %475 = arith.cmpi ne, %474, %c0_i32_33 : i32
      scf.if %475 {
        %cst_38 = arith.constant 0.000000e+00 : f32
        %480 = vector.broadcast %cst_38 : f32 to vector<1x1xf32>
        %c0_39 = arith.constant 0 : index
        %c0_40 = arith.constant 0 : index
        %481 = vector.load %arg8[%c0_39, %c0_40] : memref<1x1xf32, #tpu.memory_space<vmem>>, vector<1x1xf32>
        tpu.vector_store %arg8[%c0_39, %c0_40], %480 {strides = array<i32>} : memref<1x1xf32, #tpu.memory_space<vmem>>, vector<1x1xf32>,
      } else {
      }
      %c0_34 = arith.constant 0 : index
      %c0_35 = arith.constant 0 : index
      %476 = vector.load %arg8[%c0_34, %c0_35] : memref<1x1xf32, #tpu.memory_space<vmem>>, vector<1x1xf32>
      %477 = vector.broadcast %472 : f32 to vector<1x1xf32>
      %478 = arith.maximumf %476, %477 : vector<1x1xf32>
      %c0_36 = arith.constant 0 : index
      %c0_37 = arith.constant 0 : index
      %479 = vector.load %arg8[%c0_36, %c0_37] : memref<1x1xf32, #tpu.memory_space<vmem>>, vector<1x1xf32>
      tpu.vector_store %arg8[%c0_36, %c0_37], %478 {strides = array<i32>} : memref<1x1xf32, #tpu.memory_space<vmem>>, vector<1x1xf32>,
    } else {
    }
    %c1_i32 = arith.constant 1 : i32
    %5 = arith.cmpi eq, %arg1, %c1_i32 : i32
    %6 = arith.extui %5 : i1 to i32
    %c0_i32_1 = arith.constant 0 : i32
    %7 = arith.cmpi ne, %6, %c0_i32_1 : i32
    scf.if %7 {
      %8 = arith.index_cast %arg0 : i32 to index
      %c80 = arith.constant 80 : index
      %9 = memref.load %arg3[%8, %c80] : memref<2x81xf32, #tpu.memory_space<smem>>
      %c0 = arith.constant 0 : index
      %c0_2 = arith.constant 0 : index
      %10 = vector.load %arg8[%c0, %c0_2] : memref<1x1xf32, #tpu.memory_space<vmem>>, vector<1x1xf32>
      %11 = vector.broadcast %9 : f32 to vector<1x1xf32>
      %12 = arith.divf %11, %10 : vector<1x1xf32>
      %13 = arith.index_cast %1 : i32 to index
      %c0_3 = arith.constant 0 : index
      %14 = vector.load %arg6[%13, %c0_3] : memref<16x128xf32, #tpu.memory_space<vmem>>, vector<16x128xf32>
      %c0_4 = arith.constant 0 : index
      %c0_5 = arith.constant 0 : index
      %c0_6 = arith.constant 0 : index
      %c0_7 = arith.constant 0 : index
      %15 = vector.load %arg4[%c0_4, %c0_5, %c0_6, %c0_7] : memref<1x4x16x128xf32, #tpu.memory_space<vmem>>, vector<1x1x16x128xf32>
      %16 = vector.shape_cast %15 : vector<1x1x16x128xf32> to vector<16x128xf32>
      %c0_8 = arith.constant 0 : index
      %17 = arith.index_cast %1 : i32 to index
      %c0_9 = arith.constant 0 : index
      %18 = vector.load %arg7[%c0_8, %17, %c0_9] : memref<4x16x128xf32, #tpu.memory_space<vmem>>, vector<1x16x128xf32>
      %19 = vector.shape_cast %18 : vector<1x16x128xf32> to vector<16x128xf32>
      %20 = arith.mulf %16, %14 : vector<16x128xf32>
      %21 = arith.subf %19, %20 : vector<16x128xf32>
      %22 = vector.broadcast %12 : vector<1x1xf32> to vector<16x128xf32>
      %23 = arith.mulf %21, %22 : vector<16x128xf32>
      %24 = arith.addf %16, %23 : vector<16x128xf32>
      %c0_10 = arith.constant 0 : index
      %c0_11 = arith.constant 0 : index
      %c0_12 = arith.constant 0 : index
      %c0_13 = arith.constant 0 : index
      %25 = vector.load %arg5[%c0_10, %c0_11, %c0_12, %c0_13] : memref<1x4x16x128xf32, #tpu.memory_space<vmem>>, vector<1x1x16x128xf32>
      %26 = vector.shape_cast %25 : vector<1x1x16x128xf32> to vector<16x128xf32>
      %27 = vector.shape_cast %24 : vector<16x128xf32> to vector<1x1x16x128xf32>
      tpu.vector_store %arg5[%c0_10, %c0_11, %c0_12, %c0_13], %27 {strides = array<i32>} : memref<1x4x16x128xf32, #tpu.memory_space<vmem>>, vector<1x1x16x128xf32>,
      %c0_14 = arith.constant 0 : index
      %c1 = arith.constant 1 : index
      %c0_15 = arith.constant 0 : index
      %c0_16 = arith.constant 0 : index
      %28 = vector.load %arg4[%c0_14, %c1, %c0_15, %c0_16] : memref<1x4x16x128xf32, #tpu.memory_space<vmem>>, vector<1x1x16x128xf32>
      %29 = vector.shape_cast %28 : vector<1x1x16x128xf32> to vector<16x128xf32>
      %c1_17 = arith.constant 1 : index
      %30 = arith.index_cast %1 : i32 to index
      %c0_18 = arith.constant 0 : index
      %31 = vector.load %arg7[%c1_17, %30, %c0_18] : memref<4x16x128xf32, #tpu.memory_space<vmem>>, vector<1x16x128xf32>
      %32 = vector.shape_cast %31 : vector<1x16x128xf32> to vector<16x128xf32>
      %33 = arith.mulf %29, %14 : vector<16x128xf32>
      %34 = arith.subf %32, %33 : vector<16x128xf32>
      %35 = vector.broadcast %12 : vector<1x1xf32> to vector<16x128xf32>
      %36 = arith.mulf %34, %35 : vector<16x128xf32>
      %37 = arith.addf %29, %36 : vector<16x128xf32>
      %c0_19 = arith.constant 0 : index
      %c1_20 = arith.constant 1 : index
      %c0_21 = arith.constant 0 : index
      %c0_22 = arith.constant 0 : index
      %38 = vector.load %arg5[%c0_19, %c1_20, %c0_21, %c0_22] : memref<1x4x16x128xf32, #tpu.memory_space<vmem>>, vector<1x1x16x128xf32>
      %39 = vector.shape_cast %38 : vector<1x1x16x128xf32> to vector<16x128xf32>
      %40 = vector.shape_cast %37 : vector<16x128xf32> to vector<1x1x16x128xf32>
      tpu.vector_store %arg5[%c0_19, %c1_20, %c0_21, %c0_22], %40 {strides = array<i32>} : memref<1x4x16x128xf32, #tpu.memory_space<vmem>>, vector<1x1x16x128xf32>,
      %c0_23 = arith.constant 0 : index
      %c2 = arith.constant 2 : index
      %c0_24 = arith.constant 0 : index
      %c0_25 = arith.constant 0 : index
      %41 = vector.load %arg4[%c0_23, %c2, %c0_24, %c0_25] : memref<1x4x16x128xf32, #tpu.memory_space<vmem>>, vector<1x1x16x128xf32>
      %42 = vector.shape_cast %41 : vector<1x1x16x128xf32> to vector<16x128xf32>
      %c2_26 = arith.constant 2 : index
      %43 = arith.index_cast %1 : i32 to index
      %c0_27 = arith.constant 0 : index
      %44 = vector.load %arg7[%c2_26, %43, %c0_27] : memref<4x16x128xf32, #tpu.memory_space<vmem>>, vector<1x16x128xf32>
      %45 = vector.shape_cast %44 : vector<1x16x128xf32> to vector<16x128xf32>
      %46 = arith.mulf %42, %14 : vector<16x128xf32>
      %47 = arith.subf %45, %46 : vector<16x128xf32>
      %48 = vector.broadcast %12 : vector<1x1xf32> to vector<16x128xf32>
      %49 = arith.mulf %47, %48 : vector<16x128xf32>
      %50 = arith.addf %42, %49 : vector<16x128xf32>
      %c0_28 = arith.constant 0 : index
      %c2_29 = arith.constant 2 : index
      %c0_30 = arith.constant 0 : index
      %c0_31 = arith.constant 0 : index
      %51 = vector.load %arg5[%c0_28, %c2_29, %c0_30, %c0_31] : memref<1x4x16x128xf32, #tpu.memory_space<vmem>>, vector<1x1x16x128xf32>
      %52 = vector.shape_cast %51 : vector<1x1x16x128xf32> to vector<16x128xf32>
      %53 = vector.shape_cast %50 : vector<16x128xf32> to vector<1x1x16x128xf32>
      tpu.vector_store %arg5[%c0_28, %c2_29, %c0_30, %c0_31], %53 {strides = array<i32>} : memref<1x4x16x128xf32, #tpu.memory_space<vmem>>, vector<1x1x16x128xf32>,
      %c0_32 = arith.constant 0 : index
      %c3 = arith.constant 3 : index
      %c0_33 = arith.constant 0 : index
      %c0_34 = arith.constant 0 : index
      %54 = vector.load %arg4[%c0_32, %c3, %c0_33, %c0_34] : memref<1x4x16x128xf32, #tpu.memory_space<vmem>>, vector<1x1x16x128xf32>
      %55 = vector.shape_cast %54 : vector<1x1x16x128xf32> to vector<16x128xf32>
      %c3_35 = arith.constant 3 : index
      %56 = arith.index_cast %1 : i32 to index
      %c0_36 = arith.constant 0 : index
      %57 = vector.load %arg7[%c3_35, %56, %c0_36] : memref<4x16x128xf32, #tpu.memory_space<vmem>>, vector<1x16x128xf32>
      %58 = vector.shape_cast %57 : vector<1x16x128xf32> to vector<16x128xf32>
      %59 = arith.mulf %55, %14 : vector<16x128xf32>
      %60 = arith.subf %58, %59 : vector<16x128xf32>
      %61 = vector.broadcast %12 : vector<1x1xf32> to vector<16x128xf32>
      %62 = arith.mulf %60, %61 : vector<16x128xf32>
      %63 = arith.addf %55, %62 : vector<16x128xf32>
      %c0_37 = arith.constant 0 : index
      %c3_38 = arith.constant 3 : index
      %c0_39 = arith.constant 0 : index
      %c0_40 = arith.constant 0 : index
      %64 = vector.load %arg5[%c0_37, %c3_38, %c0_39, %c0_40] : memref<1x4x16x128xf32, #tpu.memory_space<vmem>>, vector<1x1x16x128xf32>
      %65 = vector.shape_cast %64 : vector<1x1x16x128xf32> to vector<16x128xf32>
      %66 = vector.shape_cast %63 : vector<16x128xf32> to vector<1x1x16x128xf32>
      tpu.vector_store %arg5[%c0_37, %c3_38, %c0_39, %c0_40], %66 {strides = array<i32>} : memref<1x4x16x128xf32, #tpu.memory_space<vmem>>, vector<1x1x16x128xf32>,
    } else {
    }
    return
  }
  func.func @transform_0(%arg0: i32, %arg1: i32, %arg2: i32) -> (i32, i32) {
    %c0_i32 = arith.constant 0 : i32
    %c0_i32_0 = arith.constant 0 : i32
    %c0_i32_1 = arith.constant 0 : i32
    return %c0_i32, %c0_i32_0 : i32, i32
  }
  func.func @transform_1(%arg0: i32, %arg1: i32, %arg2: i32) -> (i32, i32, i32, i32) {
    %0 = arith.muli %arg1, %arg2 : i32
    %c0_i32 = arith.constant 0 : i32
    %c0_i32_0 = arith.constant 0 : i32
    %c0_i32_1 = arith.constant 0 : i32
    return %arg0, %c0_i32, %0, %c0_i32_0 : i32, i32, i32, i32
  }
  func.func @transform_2(%arg0: i32, %arg1: i32, %arg2: i32) -> (i32, i32, i32, i32) {
    %0 = arith.muli %arg1, %arg2 : i32
    %c0_i32 = arith.constant 0 : i32
    %c0_i32_0 = arith.constant 0 : i32
    %c0_i32_1 = arith.constant 0 : i32
    return %arg0, %c0_i32, %0, %c0_i32_0 : i32, i32, i32, i32
  }
}

</mosaic_0001>

<bundles_post_ra>
// kernel: tpu_custom_call.1
= control target key start
LH: loop header
LB: loop body
LE: loop exit
PB: predicated region body
PF: predicated region fallthrough
CT: control target
= control target key end

     0   :  { %s2191_s0 = inlined_call_operand.hbm [shape: f32[2,81], index: 0, kind: input, shape index: {}]   ;;  %s2192_s1 = inlined_call_operand.hbm [shape: f32[2,4,16,128], index: 1, kind: input, shape index: {}]   ;;  %s2193_s2 = inlined_call_operand.hbm [shape: f32[2,4,16,128], index: 2, kind: output, shape index: {}]  }
   0x1   :  { %2210 = sst [smem:[#allocation25_spill]] %s2191_s0 }
   0x2   :  { %2211 = sst [smem:[#allocation26_spill]] %s2192_s1 }
   0x3   :  { %2212 = sst [smem:[#allocation27_spill]] %s2193_s2 }
   0x4   :  { %7 = vsyncpa [#allocation8], 0 }
   0x5   :  { %8 = vsyncpa [#allocation6], 0 }
   0x6   :  { %10 = vsyncpa [#allocation6 + $0x1], 0 }
   0x7   :  { %11 = vsyncpa [#allocation7], 0 }
   0x8   :  { %13 = vsyncpa [#allocation7 + $0x1], 0  ;;  %s1445_s9 = smov 0   ;;  %s1447_s10 = smov 0  }
   0x9   :  { %s1449_s11 = smov 0   ;;  %s1451_s12 = smov 0  }
   0xa   :  { %s1453_s13 = smov 0   ;;  %s1455_s14 = smov 0  }
   0xb   :  { %s1457_s15 = smov 0   ;;  %s1459_s16 = smov 0  }
   0xc LB: > { %2213 = sst [smem:[#allocation14_spill]] %s1391_s9  ;;  %s1092_s17 = sadd.s32 4294967295, %s1419_s16   ;;  %s1419_s16 = sphi %s1459_s16, %s19_s16   ;;  %s1415_s15 = sphi %s1457_s15, %s2248_s15   ;;  %s1411_s14 = sphi %s1455_s14, %s2247_s14   ;;  %s1407_s13 = sphi %s1453_s13, %s2246_s13   ;;  %s1403_s12 = sphi %s1451_s12, %s2245_s12   ;;  %s1399_s11 = sphi %s1449_s11, %s2244_s11   ;;  %s1395_s10 = sphi %s1447_s10, %s2243_s10   ;;  %s1391_s9 = sphi %s1445_s9, %s2242_s9  }
   0xd   : > { %2214 = sst [smem:[#allocation15_spill]] %s1395_s10  ;;  %s1093_s18 = sadd.s32 4294967294, %s1419_s16  }
   0xe   : > { %2215 = sst [smem:[#allocation16_spill]] %s1399_s11  ;;  %s70_s19 = sadd.s32 1, %s1399_s11 }
   0xf   : > { %2216 = sst [smem:[#allocation17_spill]] %s1411_s14  ;;  %p77_p0 = scmp.ne.s32.totalorder %s1399_s11, %s1395_s10 }
  0x10   : > { %2217 = sst [smem:[#allocation18_spill]] %s1415_s15  ;;  %p78_p1 = scmp.eq.s32.totalorder %s1419_s16, 0 }
  0x11   : > { %2218 = sst [smem:[#allocation19_spill]] %s1419_s16  ;;  %p83_p2 = scmp.ne.s32.totalorder %s1395_s10, %s1391_s9 }
  0x12   : > { %p1493_p3 = scmp.eq.s32.totalorder %s1092_s17, 0  ;;  %p111_p4 = scmp.eq.s32.totalorder %s1092_s17, 3 }
  0x13   : > { %p79_p5 = por %p78_p1, %p77_p0  ;;  %p117_p6 = scmp.eq.s32.totalorder %s1093_s18, 3 }
  0x14   : > { %s2219_s20 = scalar_select %p1493_p3, 1, 0 }
  0x15   : > { %p1499_p7 = por %p1493_p3, %p83_p2  ;;  %p1503_p8 = por %p111_p4, %p77_p0 }
  0x16   : > { %p1507_p9 = por %p117_p6, %p83_p2  ;;  %p1094_p10 = scmp.ge.s32.totalorder %s1419_s16, 1 }
  0x17   : > { %s2220_s21 = scalar_select %p1499_p7, 1, 0 }
  0x18   : > { %s2221_s22 = scalar_select %p1503_p8, 1, 0 }
  0x19   : > { %s2223_s23 = scalar_select %p1507_p9, 1, 0 }
  0x1a   : > { %2222 = sst [smem:[#allocation20_spill]] %s2221_s22  ;;  %p124_p11 = scmp.lt.s32.totalorder %s1419_s16, 5 }
  0x1b   : > { %2224 = sst [smem:[#allocation21_spill]] %s2223_s23  ;;  %p1165_p13 = scmp.lt.s32.totalorder %s1419_s16, 4 }
  0x1c   : > { %p1513_p12 = pnand %p1094_p10, %p124_p11  ;;  %p2227_p0 = scmp.ne.s32.totalorder %s2219_s20, 0 }
  0x1d   : > { %p1520_p3 = pnand %p1165_p13, %p79_p5  ;;  %s34_s26 = sadd.s32 1, %s1411_s14 }
  0x1e   : > { %p1152_p1 = pneg %p1513_p12  ;;  %s38_s27 = sadd.s32 1, %s1415_s15 }
  0x1f   : > { %p36_p2 = scmp.ge.s32.totalorder %s34_s26, 2  ;;  %s2228_s0 = sld [smem:[#allocation25_spill]] }
  0x20   : > { %p1153_p4 = pnand %p1152_p1, %p2227_p0 }
  0x22   : > { %p1276_p10 = pneg %p1153_p4 }
  0x25   : > { %s1274_s30 = scalar_lea.hbm %s2228_s0, 32 }
  0x26   : > { %p1275_p6 = scmp.ne.s32.totalorder %s2228_s0, %s1274_s30  ;;  %p1281_p5 = scmp.lt.u32.totalorder %s1274_s30, %s2228_s0 }
  0x28   : > { %p1277_p11 = pnand %p1276_p10, %p1275_p6 }
  0x2a   : > { %p1278_p9 = pneg %p1277_p11 }
  0x2c   : > { %p1283_p13 = pnand %p1281_p5, %p1278_p9 }
  0x2e   : > { %1286 = shalt.err (!%p1283_p13)
}
  0x2f   : > { %s1421_s7 = smov [#allocation5]   ;;  %s2250_s26 = smov (%p36_p2, %s34_s26), 0 }
  0x30   : > { %1155 = dma.hbm_to_smem (!%p1153_p4), %s2228_s0, 32, %s1421_s7, [#allocation8]  }
  0x31   : > { %2229 = sst [smem:[#allocation22_spill]] %s2250_s26  ;;  %s2252_s27 = smov (!%p36_p2, %s38_s27), %s1415_s15 }
  0x32   : > { %s146_s18 = sand.u32 1, %s1399_s11   ;;  %s1140_s28 = sshll.u32 %s1415_s15, 10 }
  0x33   : > { %p40_p9 = scmp.ge.s32.totalorder %s2252_s27, 2  ;;  %s1097_s29 = sshll.u32 %s146_s18, 6 }
  0x34   : > { %s2230_s1 = sld [smem:[#allocation26_spill]]  ;;  %s150_s6 = scalar_lea.vmem [#allocation9], %s1097_s29 }
  0x35   : > { %s2254_s27 = smov (%p40_p9, %s2252_s27), 0  ;;  %s160_s7 = sshll.u32 %s150_s6, 4  ;;  %s1554_s7 = int_to_ptr.vmem [resolvable:$true] %s160_s7 }
  0x36   : > { %2231 = sst [smem:[#allocation23_spill]] %s2254_s27  ;;  %s65_s5 = ssub.s32 %s1415_s15, %s2254_s27 }
  0x37   : > { %p68_p1 = scmp.eq.s32.totalorder %s65_s5, 0  ;;  %s1561_s17 = scalar_lea.sflag [#allocation6], %s146_s18 }
  0x38   : > { %p1289_p4 = pneg %p1520_p3 }
  0x39   : > { %s1559_s8 = scalar_select %p68_p1, %s1399_s11, %s70_s19  }
  0x3a   : > { %s1548_s4 = scalar_lea.hbm %s2230_s1, %s1140_s28  ;;  %s1292_s29 = scalar_lea.hbm %s2230_s1, 2048 }
  0x3b   : > { %2232 = sst [smem:[#allocation24_spill]] %s1559_s8  ;;  %s1287_s28 = scalar_lea.hbm %s1548_s4, 1024 }
  0x3c   : > { %p1288_p0 = scmp.ne.s32.totalorder %s1548_s4, %s1287_s28  ;;  %p1293_p10 = scmp.lt.u32.totalorder %s1548_s4, %s2230_s1 }
  0x3d   : > { %p1294_p11 = scmp.lt.u32.totalorder %s1292_s29, %s1287_s28  ;;  %p1296_p13 = scmp.lt.u32.totalorder %s1287_s28, %s1548_s4 }
  0x3e   : > { %p1290_p2 = pnand %p1289_p4, %p1288_p0 }
  0x3f   : > { %p1295_p5 = por %p1294_p11, %p1293_p10 }
  0x40   : > { %p1291_p6 = pneg %p1290_p2 }
  0x41   : > { %p1297_p9 = por %p1296_p13, %p1295_p5 }
  0x43   : > { %p1298_p1 = pnand %p1297_p9, %p1291_p6 }
  0x45   : > { %1301 = shalt.err (!%p1298_p1)
}
  0x46   : > { %s1302_s19 = scalar_lea.vmem %s1554_s7, 1024  ;;  %s1422_s18 = smov [#allocation9]  }
  0x47   : > { %p1303_p0 = scmp.ne.s32.totalorder %s1554_s7, %s1302_s19  ;;  %s1307_s30 = sshll.u32 %s1422_s18, 4  ;;  %s1308_s30 = int_to_ptr.vmem [resolvable:$false] %s1307_s30 }
  0x48   : > { %s1309_s3 = scalar_lea.vmem %s1308_s30, 2048  ;;  %p1310_p7 = scmp.lt.s32.totalorder %s1554_s7, %s1308_s30 }
  0x49   : > { %p1305_p2 = pnand %p1303_p0, %p1289_p4  ;;  %p1311_p10 = scmp.lt.s32.totalorder %s1309_s3, %s1302_s19 }
  0x4b   : > { %p1306_p8 = pneg %p1305_p2  ;;  %p1312_p11 = por %p1311_p10, %p1310_p7 }
  0x4d   : > { %p1313_p5 = pnand %p1312_p11, %p1306_p8 }
  0x4f   : > { %1316 = shalt.err (!%p1313_p5)
}
  0x50   : > { %s1423_s28 = smov 128   ;;  %s1424_s29 = smov 8  }
  0x51   : > { %1159 = dma.hbm_to_vmem [thread:$0]  (!%p1520_p3), %s1548_s4, 1024, %s1554_s7, %s1561_s17, %s1423_s28, %s1423_s28, %s1424_s29  }
  0x52   : > { %172 = sbr.rel (%p1513_p12) target bundleno = 610 (0x262), region = 28  ;;  %p2233_p4 = scmp.ne.s32.totalorder (!%p1513_p12), %s2219_s20, 0 }
  0x59   : > { %1378 = dma.done.wait (%p2233_p4), [#allocation8], 32  }
  0x5a   : > { %1380 = vsyncadd (%p2233_p4), [#allocation8], 4294967264  ;;  %s1596_s5 = sand.u32 1, %s1395_s10   ;;  %p2234_p3 = scmp.ne.s32.totalorder %s2220_s21, 0 }
  0x5b   : > { %s1102_s6 = sshll.u32 %s1596_s5, 6  ;;  %s179_s19 = scalar_lea.sflag [#allocation6], %s1596_s5 }
  0x5c   : > { %s1600_s18 = scalar_lea.vmem [#allocation9], %s1102_s6 }
  0x5d   : > { %1382 = dma.done.wait (%p2234_p3), %s179_s19, 1024  }
  0x5e   : > { %1384 = vsyncadd (%p2234_p3), %s179_s19, 4294966272 }
  0x5f   : > { %187 = sfence }
  0x60   : > { %s1606_s24 = scalar_lea.vmem [#allocation10], %s1102_s6  ;;  %p1104_p7 = scmp.ne.s32.totalorder %s1403_s12, 0 }
  0x61   : > { %v213_v0 = vlaneseq (!%p1104_p7)  ;;  %s1610_s20 = sshll.u32 (!%p1104_p7), %s1407_s13, 7  ;;  %vm845_vm1 = vcmask (!%p1104_p7), 0  }
  0x62   : > { %212 = sbr.rel (%p1104_p7) target bundleno = 424 (0x1a8), region = 40  ;;  %s231_s25 = sadd.s32 (!%p1104_p7), 16, %s1610_s20 }
  0x63   : > { %v214_v1 = vshrl.u32 (!%p1104_p7), %v213_v0, 7  ;;  %v1613_v2 = vand.u32 (!%p1104_p7), 127, %v213_v0  ;;  %s232_s21 = sld [smem:[#allocation5 + %s231_s25]] (!%p1104_p7)  ;;  %s238_s4 = sadd.s32 (!%p1104_p7), 24, %s1610_s20 }
  0x64   : > { %s1616_s7 = sld [smem:[#allocation5 + %s238_s4]] (!%p1104_p7)  ;;  %s243_s17 = sadd.s32 (!%p1104_p7), 8, %s1610_s20 }
  0x65   : > { %v215_v3 = vadd.s32 (!%p1104_p7), 8, %v214_v1  ;;  %v221_v4 = vcvt.s32.f32 (!%p1104_p7), %v214_v1  ;;  %v227_v5 = vcvt.s32.f32 (!%p1104_p7), %v1613_v2  ;;  %s235_s30 = sld [smem:[#allocation5 + %s1610_s20]] (!%p1104_p7)  ;;  %s248_s28 = sadd.s32 (!%p1104_p7), 32, %s1610_s20  ;;  %vm826_vm0 = vcmp.lt.s32.totalorder (!%p1104_p7), %v1613_v2, 16 }
  0x66   : > { %s1621_s3 = sld [smem:[#allocation5 + %s243_s17]] (!%p1104_p7)  ;;  %s302_s6 = sadd.s32 (!%p1104_p7), 17, %s1610_s20 }
  0x67   : > { %v222_v6 = vcvt.s32.f32 (!%p1104_p7), %v215_v3  ;;  %v223_v7 = vmul.f32 (!%p1104_p7), 0.13333334, %v221_v4  ;;  %v228_v8 = vmul.f32 (!%p1104_p7), 0.13333334, %v227_v5  ;;  %s1629_s29 = sld [smem:[#allocation5 + %s248_s28]] (!%p1104_p7)  ;;  %s306_s25 = sadd.s32 (!%p1104_p7), 1, %s1610_s20 }
  0x68   : > { %s303_s19 = sld [smem:[#allocation5 + %s302_s6]] (!%p1104_p7)  ;;  %s310_s4 = sadd.s32 (!%p1104_p7), 25, %s1610_s20 }
  0x69   : > { %v224_v9 = vmul.f32 0.13333334, %v222_v6  ;;  %v1624_v10 = vadd.f32 -1.0, %v228_v8  ;;  %v1626_v11 = vadd.f32 -1.0, %v223_v7  ;;  %v233_v12 = vstv %s232_s21  ;;  %s307_s17 = sld [smem:[#allocation5 + %s306_s25]]  ;;  %s315_s21 = sadd.s32 9, %s1610_s20 }
  0x6a   : > { %v240_v13 = vstv %s1616_s7  ;;  %s311_s0 = sld [smem:[#allocation5 + %s310_s4]]  ;;  %s320_s7 = sadd.s32 33, %s1610_s20 }
  0x6b   : > { %v1632_v14 = vadd.f32 -1.0, %v224_v9  ;;  %v234_v15 = vsub.f32 %v1624_v10, %v233_v12  ;;  %v236_v16 = vstv %s235_s30  ;;  %v241_v17 = vsub.f32 %v1626_v11, %v240_v13  ;;  %s316_s28 = sld [smem:[#allocation5 + %s315_s21]]  ;;  %s250_s1 = sadd.s32 40, %s1610_s20 }
  0x6c   : > { %v245_v18 = vstv %s1621_s3  ;;  %s1642_s6 = sld [smem:[#allocation5 + %s320_s7]]  ;;  %s322_s30 = sadd.s32 41, %s1610_s20 }
  0x6d   : > { %v242_v19 = vsub.f32 %v1632_v14, %v240_v13  ;;  %v237_v20 = vmul.f32 %v236_v16, %v234_v15  ;;  %v246_v21 = vmul.f32 %v245_v18, %v241_v17  ;;  %s257_s27 = smul.f32 2.0, %s1629_s29  ;;  %s1648_s3 = sld [smem:[#allocation5 + %s250_s1]] }
  0x6e   : > { %v304_v22 = vstv %s303_s19  ;;  %s374_s25 = sadd.s32 18, %s1610_s20  ;;  %s1653_s29 = sld [smem:[#allocation5 + %s322_s30]] }
  0x6f   : > { %v305_v23 = vsub.f32 %v1624_v10, %v304_v22  ;;  %v247_v24 = vmul.f32 %v245_v18, %v242_v19  ;;  %v308_v25 = vstv %s307_s17  ;;  %v252_v27 = vmul.f32 %v237_v20, %v237_v20  ;;  %s378_s1 = sadd.s32 2, %s1610_s20  ;;  %s382_s17 = sadd.s32 26, %s1610_s20 }
  0x70   : > { %v312_v26 = vstv %s311_s0  ;;  %v253_v30 = vmul.f32 %v246_v21, %v246_v21  ;;  %v258_v31 = vmul.f32 %v246_v21, %v237_v20  ;;  %v260_v34 = vstv %s257_s27  ;;  %s1656_s0 = sld [smem:[#allocation5 + %s374_s25]]  ;;  %s387_s27 = sadd.s32 10, %s1610_s20 }
  0x71   : > { %v309_v28 = vmul.f32 %v308_v25, %v305_v23  ;;  %v313_v29 = vsub.f32 %v1626_v11, %v312_v26  ;;  %v314_v32 = vsub.f32 %v1632_v14, %v312_v26  ;;  %v317_v33 = vstv %s316_s28  ;;  %s1659_s4 = sld [smem:[#allocation5 + %s378_s1]]  ;;  %s392_s28 = sadd.s32 34, %s1610_s20 }
  0x72   : > { %s329_s19 = smul.f32 2.0, %s1642_s6  ;;  %v254_v36 = vmul.f32 %v247_v24, %v247_v24  ;;  %v259_v37 = vmul.f32 %v247_v24, %v237_v20  ;;  %s1662_s21 = sld [smem:[#allocation5 + %s382_s17]]  ;;  %v255_v42 = vadd.f32 %v253_v30, %v252_v27  ;;  %v261_v43 = vmul.f32 %v260_v34, %v258_v31 }
  0x73   : > { %v318_v35 = vmul.f32 %v317_v33, %v313_v29  ;;  %v319_v38 = vmul.f32 %v317_v33, %v314_v32  ;;  %v324_v39 = vmul.f32 %v309_v28, %v309_v28  ;;  %s1665_s7 = sld [smem:[#allocation5 + %s387_s27]]  ;;  %s274_s30 = sadd.s32 48, %s1610_s20  ;;  %v265_v53 = vstv %s1648_s3 }
  0x74   : > { %v332_v44 = vstv %s329_s19  ;;  %v256_v47 = vadd.f32 %v254_v36, %v252_v27  ;;  %v262_v48 = vmul.f32 %v260_v34, %v259_v37  ;;  %s1668_s6 = sld [smem:[#allocation5 + %s392_s28]]  ;;  %s281_s25 = sadd.s32 56, %s1610_s20  ;;  %v263_v52 = vsub.f32 %v255_v42, %v261_v43 }
  0x75   : > { %v325_v40 = vmul.f32 %v318_v35, %v318_v35  ;;  %v330_v41 = vmul.f32 %v318_v35, %v309_v28  ;;  %v326_v45 = vmul.f32 %v319_v38, %v319_v38  ;;  %v331_v46 = vmul.f32 %v319_v38, %v309_v28  ;;  %s288_s19 = sadd.s32 64, %s1610_s20  ;;  %s295_s1 = sadd.s32 72, %s1610_s20 }
  0x76   : > { %v376_v51 = vstv %s1656_s0  ;;  %s346_s17 = sadd.s32 49, %s1610_s20  ;;  %v264_v58 = vsub.f32 %v256_v47, %v262_v48  ;;  %s1679_s27 = sld [smem:[#allocation5 + %s274_s30]]  ;;  %v266_v63 = vsub.f32 %v265_v53, %v263_v52  ;;  %v337_v0 = vstv %s1653_s29 }
  0x77   : > { %v327_v49 = vadd.f32 %v325_v40, %v324_v39  ;;  %v333_v50 = vmul.f32 %v332_v44, %v330_v41  ;;  %v328_v54 = vadd.f32 %v326_v45, %v324_v39  ;;  %v334_v55 = vmul.f32 %v332_v44, %v331_v46  ;;  %s1681_s28 = sld [smem:[#allocation5 + %s281_s25]]  ;;  %s353_s30 = sadd.s32 57, %s1610_s20 }
  0x78   : > { %v377_v56 = vsub.f32 %v1624_v10, %v376_v51  ;;  %v384_v57 = vstv %s1662_s21  ;;  %v380_v59 = vstv %s1659_s4  ;;  %s1685_s3 = sld [smem:[#allocation5 + %s288_s19]]  ;;  %s360_s25 = sadd.s32 65, %s1610_s20  ;;  %v267_v5 = vsub.f32 %v265_v53, %v264_v58 }
  0x79   : > { %v385_v60 = vsub.f32 %v1626_v11, %v384_v57  ;;  %s1687_s0 = sld [smem:[#allocation5 + %s295_s1]]  ;;  %v335_v61 = vsub.f32 %v327_v49, %v333_v50  ;;  %v389_v62 = vstv %s1665_s7  ;;  %v336_v1 = vsub.f32 %v328_v54, %v334_v55  ;;  %s367_s26 = sadd.s32 73, %s1610_s20 }
  0x7a   : > { %s1691_s21 = sld [smem:[#allocation5 + %s346_s17]]  ;;  %v381_v3 = vmul.f32 %v380_v59, %v377_v56  ;;  %v386_v6 = vsub.f32 %v1632_v14, %v384_v57  ;;  %s401_s4 = smul.f32 2.0, %s1668_s6  ;;  %v268_v8 = vmul.f32 1.442695, %v266_v63  ;;  %v270_v16 = vmul.f32 1.442695, %v267_v5 }
  0x7b   : > { %v390_v4 = vmul.f32 %v389_v62, %v385_v60  ;;  %s446_s19 = sadd.s32 19, %s1610_s20  ;;  %v338_v7 = vsub.f32 %v337_v0, %v335_v61  ;;  %s1699_s7 = sld [smem:[#allocation5 + %s353_s30]]  ;;  %v339_v9 = vsub.f32 %v337_v0, %v336_v1 }
  0x7c   : > { %s394_s1 = sadd.s32 42, %s1610_s20  ;;  %s1702_s29 = sld [smem:[#allocation5 + %s360_s25]]  ;;  %v396_v12 = vmul.f32 %v381_v3, %v381_v3  ;;  %v391_v17 = vmul.f32 %v389_v62, %v386_v6  ;;  %v404_v18 = vstv %s401_s4  ;;  %1239 = vpow2.f32 %v268_v8 }
  0x7d   : > { %s1704_s17 = sld [smem:[#allocation5 + %s367_s26]]  ;;  %v397_v13 = vmul.f32 %v390_v4, %v390_v4  ;;  %v402_v15 = vmul.f32 %v390_v4, %v381_v3  ;;  %s454_s6 = sadd.s32 27, %s1610_s20  ;;  %v340_v19 = vmul.f32 1.442695, %v338_v7  ;;  %v342_v20 = vmul.f32 1.442695, %v339_v9 }
  0x7e   : > { %s1706_s15 = sld [smem:[#allocation5 + %s446_s19]]  ;;  %s450_s14 = sadd.s32 3, %s1610_s20  ;;  %1241 = vpow2.f32 %v270_v16  ;;  %v398_v23 = vmul.f32 %v391_v17, %v391_v17  ;;  %v403_v24 = vmul.f32 %v391_v17, %v381_v3  ;;  %v276_v30 = vstv %s1679_s27 }
  0x7f   : > { %s1709_s30 = sld [smem:[#allocation5 + %s394_s1]]  ;;  %s418_s25 = sadd.s32 50, %s1610_s20  ;;  %v399_v21 = vadd.f32 %v397_v13, %v396_v12  ;;  %v405_v22 = vmul.f32 %v404_v18, %v402_v15  ;;  %1243 = vpow2.f32 %v340_v19  ;;  %v283_v31 = vstv %s1681_s28 }
  0x80   : > { %s425_s26 = sadd.s32 58, %s1610_s20  ;;  %s1714_s8 = sld [smem:[#allocation5 + %s454_s6]]  ;;  %1245 = vpow2.f32 %v342_v20  ;;  %v400_v27 = vadd.f32 %v398_v23, %v396_v12  ;;  %v406_v28 = vmul.f32 %v404_v18, %v403_v24  ;;  %v290_v34 = vstv %s1685_s3 }
  0x81   : > { %s464_s11 = sadd.s32 35, %s1610_s20  ;;  %s1717_s19 = sld [smem:[#allocation5 + %s450_s14]]  ;;  %v407_v25 = vsub.f32 %v399_v21, %v405_v22  ;;  %v297_v35 = vstv %s1687_s0  ;;  %v348_v38 = vstv %s1691_s21  ;;  %v355_v39 = vstv %s1699_s7 }
  0x82   : > { %s459_s1 = sadd.s32 11, %s1610_s20  ;;  %s1720_s4 = sld [smem:[#allocation5 + %s418_s25]]  ;;  %v362_v40 = vstv %s1702_s29  ;;  %v408_v41 = vsub.f32 %v400_v27, %v406_v28 }
  0x83   : > { %s1722_s6 = sld [smem:[#allocation5 + %s425_s26]]  ;;  %s432_s10 = sadd.s32 66, %s1610_s20  ;;  %v369_v43 = vstv %s1704_s17 }
  0x84   : > { %s1725_s23 = sld [smem:[#allocation5 + %s464_s11]]  ;;  %s439_s14 = sadd.s32 74, %s1610_s20  ;;  %v448_v26 = vstv %s1706_s15 }
  0x85   : > { %s1728_s9 = sld [smem:[#allocation5 + %s459_s1]]  ;;  %s466_s25 = sadd.s32 43, %s1610_s20  ;;  %v409_v29 = vstv %s1709_s30  ;;  %v449_v32 = vsub.f32 %v1624_v10, %v448_v26 }
  0x86   : > { %s490_s16 = sadd.s32 51, %s1610_s20  ;;  %s1734_s26 = sld [smem:[#allocation5 + %s432_s10]]  ;;  %v456_v33 = vstv %s1714_s8  ;;  %v410_v36 = vsub.f32 %v409_v29, %v407_v25  ;;  %v1240_v42 = vpop.eup %1239  ;;  %v411_v60 = vsub.f32 %v409_v29, %v408_v41 }
  0x87   : > { %s497_s11 = sadd.s32 59, %s1610_s20  ;;  %s1737_s1 = sld [smem:[#allocation5 + %s439_s14]]  ;;  %v452_v37 = vstv %s1717_s19  ;;  %v457_v45 = vsub.f32 %v1626_v11, %v456_v33  ;;  %v458_v46 = vsub.f32 %v1632_v14, %v456_v33  ;;  %v277_v48 = vmul.f32 %v1240_v42, %v276_v30 }
  0x88   : > { %s504_s2 = sadd.s32 67, %s1610_s20  ;;  %s1744_s15 = sld [smem:[#allocation5 + %s466_s25]]  ;;  %v420_v44 = vstv %s1720_s4  ;;  %v1242_v47 = vpop.eup %1241  ;;  %v284_v49 = vmul.f32 %v1240_v42, %v283_v31  ;;  %v453_v50 = vmul.f32 %v452_v37, %v449_v32  ;;  %v291_v54 = vmul.f32 %v1240_v42, %v290_v34 }
  0x89   : > { %s1746_s30 = sld [smem:[#allocation5 + %s490_s16]]  ;;  %s511_s27 = sadd.s32 75, %s1610_s20  ;;  %v1244_v52 = vpop.eup %1243  ;;  %v278_v53 = vmul.f32 %v1242_v47, %v276_v30  ;;  %v298_v55 = vmul.f32 %v1240_v42, %v297_v35  ;;  %v412_v56 = vmul.f32 1.442695, %v410_v36  ;;  %v285_v57 = vmul.f32 %v1242_v47, %v283_v31 }
  0x8a   : > { %s1751_s10 = sld [smem:[#allocation5 + %s497_s11]]  ;;  %s518_s28 = sadd.s32 20, %s1610_s20  ;;  %v292_v58 = vmul.f32 %v1242_v47, %v290_v34  ;;  %v299_v59 = vmul.f32 %v1242_v47, %v297_v35  ;;  %v1246_v61 = vpop.eup %1245  ;;  %v427_v62 = vstv %s1722_s6  ;;  %v1781_v3 = vadd.f32 %v1244_v52, %v1240_v42 }
  0x8b   : > { %s1757_s8 = sld [smem:[#allocation5 + %s504_s2]]  ;;  %s473_s16 = smul.f32 2.0, %s1725_s23  ;;  %v461_v51 = vstv %s1728_s9  ;;  %v349_v4 = vmul.f32 %v1244_v52, %v348_v38  ;;  %v468_v6 = vmul.f32 %v453_v50, %v453_v50  ;;  %v350_v7 = vmul.f32 %v1246_v61, %v348_v38 }
  0x8c   : > { %s526_s3 = sadd.s32 28, %s1610_s20  ;;  %s1767_s0 = sld [smem:[#allocation5 + %s511_s27]]  ;;  %v434_v63 = vstv %s1734_s26  ;;  %v462_v0 = vmul.f32 %v461_v51, %v457_v45  ;;  %v463_v1 = vmul.f32 %v461_v51, %v458_v46  ;;  %v356_v8 = vmul.f32 %v1244_v52, %v355_v39 }
  0x8d   : > { %s522_s2 = sadd.s32 4, %s1610_s20  ;;  %s1770_s21 = sld [smem:[#allocation5 + %s518_s28]]  ;;  %v441_v5 = vstv %s1737_s1  ;;  %v363_v9 = vmul.f32 %v1244_v52, %v362_v40  ;;  %1247 = vpow2.f32 %v412_v56  ;;  %v1792_v12 = vadd.f32 %v1246_v61, %v1242_v47 }
  0x8e   : > { %s536_s7 = sadd.s32 36, %s1610_s20  ;;  %s1773_s9 = sld [smem:[#allocation5 + %s526_s3]]  ;;  %v357_v13 = vmul.f32 %v1246_v61, %v355_v39  ;;  %v370_v15 = vmul.f32 %v1244_v52, %v369_v43  ;;  %v414_v16 = vmul.f32 1.442695, %v411_v60  ;;  %v469_v17 = vmul.f32 %v462_v0, %v462_v0 }
  0x8f   : > { %s531_s17 = sadd.s32 12, %s1610_s20  ;;  %s1778_s19 = sld [smem:[#allocation5 + %s522_s2]]  ;;  %v470_v18 = vmul.f32 %v463_v1, %v463_v1  ;;  %v474_v19 = vmul.f32 %v462_v0, %v453_v50  ;;  %v475_v20 = vmul.f32 %v463_v1, %v453_v50  ;;  %v1800_v21 = vadd.f32 %v349_v4, %v277_v48 }
  0x90   : > { %s590_s14 = sadd.s32 21, %s1610_s20  ;;  %s1784_s25 = sld [smem:[#allocation5 + %s536_s7]]  ;;  %v364_v22 = vmul.f32 %v1246_v61, %v362_v40  ;;  %v371_v23 = vmul.f32 %v1246_v61, %v369_v43  ;;  %v476_v24 = vstv %s473_s16  ;;  %v1807_v25 = vadd.f32 %v350_v7, %v278_v53 }
  0x91   : > { %s598_s11 = sadd.s32 29, %s1610_s20  ;;  %s1789_s27 = sld [smem:[#allocation5 + %s531_s17]]  ;;  %v1809_v26 = vadd.f32 %v356_v8, %v284_v49  ;;  %v1811_v27 = vadd.f32 %v363_v9, %v291_v54  ;;  %v1818_v29 = vadd.f32 %v357_v13, %v285_v57  ;;  %v1820_v30 = vadd.f32 %v370_v15, %v298_v55 }
  0x92   : > { %s538_s28 = sadd.s32 44, %s1610_s20  ;;  %s562_s3 = sadd.s32 52, %s1610_s20  ;;  %1249 = vpow2.f32 %v414_v16  ;;  %v471_v32 = vadd.f32 %v469_v17, %v468_v6  ;;  %v472_v33 = vadd.f32 %v470_v18, %v468_v6  ;;  %v477_v34 = vmul.f32 %v476_v24, %v474_v19 }
  0x93   : > { %s1795_s2 = sld [smem:[#allocation5 + %s590_s14]]  ;;  %s594_s7 = sadd.s32 5, %s1610_s20  ;;  %v520_v28 = vstv %s1770_s21  ;;  %v478_v35 = vmul.f32 %v476_v24, %v475_v20  ;;  %v1828_v36 = vadd.f32 %v364_v22, %v292_v58  ;;  %v1830_v37 = vadd.f32 %v371_v23, %v299_v59 }
  0x94   : > { %s1798_s17 = sld [smem:[#allocation5 + %s598_s11]]  ;;  %s603_s22 = sadd.s32 13, %s1610_s20  ;;  %v528_v31 = vstv %s1773_s9  ;;  %v481_v38 = vstv %s1744_s15  ;;  %v521_v39 = vsub.f32 %v1624_v10, %v520_v28  ;;  %v492_v40 = vstv %s1746_s30 }
  0x95   : > { %s1814_s14 = sld [smem:[#allocation5 + %s538_s28]]  ;;  %s608_s16 = sadd.s32 37, %s1610_s20  ;;  %v524_v41 = vstv %s1778_s19  ;;  %v529_v42 = vsub.f32 %v1626_v11, %v528_v31  ;;  %v530_v43 = vsub.f32 %v1632_v14, %v528_v31  ;;  %v499_v45 = vstv %s1751_s10 }
  0x96   : > { %s1816_s11 = sld [smem:[#allocation5 + %s562_s3]]  ;;  %s545_s21 = smul.f32 2.0, %s1784_s25  ;;  %v506_v46 = vstv %s1757_s8  ;;  %v513_v47 = vstv %s1767_s0  ;;  %v479_v50 = vsub.f32 %v471_v32, %v477_v34  ;;  %v480_v51 = vsub.f32 %v472_v33, %v478_v35 }
  0x97   : > { %s1823_s23 = sld [smem:[#allocation5 + %s594_s7]]  ;;  %s662_s9 = sadd.s32 22, %s1610_s20  ;;  %v533_v48 = vstv %s1789_s27  ;;  %v1248_v49 = vpop.eup %1247  ;;  %v525_v56 = vmul.f32 %v524_v41, %v521_v39 }
  0x98   : > { %s1825_s29 = sld [smem:[#allocation5 + %s603_s22]]  ;;  %s569_s22 = sadd.s32 60, %s1610_s20  ;;  %v421_v54 = vmul.f32 %v1248_v49, %v420_v44  ;;  %v428_v55 = vmul.f32 %v1248_v49, %v427_v62  ;;  %v548_v57 = vstv %s545_s21  ;;  %v534_v58 = vmul.f32 %v533_v48, %v529_v42 }
  0x99   : > { %s1845_s15 = sld [smem:[#allocation5 + %s608_s16]]  ;;  %v592_v52 = vstv %s1795_s2  ;;  %s666_s25 = sadd.s32 6, %s1610_s20  ;;  %v535_v59 = vmul.f32 %v533_v48, %v530_v43  ;;  %v1863_v0 = vadd.f32 %v1248_v49, %v1781_v3  ;;  %v435_v1 = vmul.f32 %v1248_v49, %v434_v63 }
  0x9a   : > { %v600_v53 = vstv %s1798_s17  ;;  %s1849_s19 = sld [smem:[#allocation5 + %s662_s9]]  ;;  %s670_s27 = sadd.s32 30, %s1610_s20  ;;  %v593_v4 = vsub.f32 %v1624_v10, %v592_v52  ;;  %v442_v7 = vmul.f32 %v1248_v49, %v441_v5  ;;  %v482_v8 = vsub.f32 %v481_v38, %v479_v50 }
  0x9b   : > { %s675_s28 = sadd.s32 14, %s1610_s20  ;;  %v553_v60 = vstv %s1814_s14  ;;  %s576_s3 = sadd.s32 68, %s1610_s20  ;;  %v601_v6 = vsub.f32 %v1626_v11, %v600_v53  ;;  %v1881_v15 = vadd.f32 %v421_v54, %v1800_v21  ;;  %v1884_v16 = vadd.f32 %v428_v55, %v1809_v26 }
  0x9c   : > { %v564_v61 = vstv %s1816_s11  ;;  %s583_s2 = sadd.s32 76, %s1610_s20  ;;  %s1869_s7 = sld [smem:[#allocation5 + %s666_s25]]  ;;  %v1250_v3 = vpop.eup %1249  ;;  %v483_v17 = vsub.f32 %v481_v38, %v480_v51  ;;  %v540_v18 = vmul.f32 %v525_v56, %v525_v56  ;;  %v541_v19 = vmul.f32 %v534_v58, %v534_v58 }
  0x9d   : > { %s680_s17 = sadd.s32 38, %s1610_s20  ;;  %v596_v9 = vstv %s1823_s23  ;;  %s1876_s16 = sld [smem:[#allocation5 + %s670_s27]]  ;;  %v542_v20 = vmul.f32 %v535_v59, %v535_v59  ;;  %v546_v22 = vmul.f32 %v534_v58, %v525_v56  ;;  %v547_v21 = vmul.f32 %v535_v59, %v525_v56 }
  0x9e   : > { %v605_v13 = vstv %s1825_s29  ;;  %s1878_s21 = sld [smem:[#allocation5 + %s675_s28]]  ;;  %s610_s23 = sadd.s32 45, %s1610_s20  ;;  %v1896_v23 = vadd.f32 %v435_v1, %v1811_v27  ;;  %v597_v24 = vmul.f32 %v596_v9, %v593_v4  ;;  %v602_v26 = vsub.f32 %v1632_v14, %v600_v53 }
  0x9f   : > { %s1888_s9 = sld [smem:[#allocation5 + %s569_s22]]  ;;  %v606_v28 = vmul.f32 %v605_v13, %v601_v6  ;;  %s634_s27 = sadd.s32 53, %s1610_s20  ;;  %v1903_v31 = vadd.f32 %v1250_v3, %v1792_v12  ;;  %v422_v32 = vmul.f32 %v1250_v3, %v420_v44  ;;  %v429_v33 = vmul.f32 %v1250_v3, %v427_v62 }
  0xa0   : > { %s1891_s29 = sld [smem:[#allocation5 + %s576_s3]]  ;;  %v436_v27 = vmul.f32 %v1250_v3, %v434_v63  ;;  %s734_s3 = sadd.s32 23, %s1610_s20  ;;  %v443_v34 = vmul.f32 %v1250_v3, %v441_v5  ;;  %v484_v35 = vmul.f32 1.442695, %v482_v8  ;;  %v486_v38 = vmul.f32 1.442695, %v483_v17 }
  0xa1   : > { %s1893_s25 = sld [smem:[#allocation5 + %s680_s17]]  ;;  %s641_s17 = sadd.s32 61, %s1610_s20  ;;  %v664_v12 = vstv %s1849_s19  ;;  %v543_v39 = vadd.f32 %v541_v19, %v540_v18  ;;  %v544_v44 = vadd.f32 %v542_v20, %v540_v18  ;;  %v549_v62 = vmul.f32 %v548_v57, %v546_v22 }
  0xa2   : > { %s1898_s22 = sld [smem:[#allocation5 + %s583_s2]]  ;;  %s617_s2 = smul.f32 2.0, %s1845_s15  ;;  %v550_v41 = vmul.f32 %v548_v57, %v547_v21  ;;  %v607_v63 = vmul.f32 %v605_v13, %v602_v26  ;;  %v612_v42 = vmul.f32 %v597_v24, %v597_v24  ;;  %v613_v5 = vmul.f32 %v606_v28, %v606_v28 }
  0xa3   : > { %s1911_s28 = sld [smem:[#allocation5 + %s610_s23]]  ;;  %s648_s6 = sadd.s32 69, %s1610_s20  ;;  %v668_v43 = vstv %s1869_s7  ;;  %v618_v48 = vmul.f32 %v606_v28, %v597_v24  ;;  %v665_v49 = vsub.f32 %v1624_v10, %v664_v12  ;;  %v672_v50 = vstv %s1876_s16 }
  0xa4   : > { %s1919_s4 = sld [smem:[#allocation5 + %s634_s27]]  ;;  %s742_s1 = sadd.s32 31, %s1610_s20  ;;  %v677_v51 = vstv %s1878_s21  ;;  %v1933_v52 = vadd.f32 %v442_v7, %v1820_v30  ;;  %v620_v53 = vstv %s617_s2  ;;  %v673_v54 = vsub.f32 %v1626_v11, %v672_v50 }
  0xa5   : > { %s1923_s26 = sld [smem:[#allocation5 + %s734_s3]]  ;;  %s738_s19 = sadd.s32 7, %s1610_s20  ;;  %v674_v55 = vsub.f32 %v1632_v14, %v672_v50  ;;  %v1940_v56 = vadd.f32 %v422_v32, %v1807_v25  ;;  %v1943_v57 = vadd.f32 %v429_v33, %v1818_v29  ;;  %1251 = vpow2.f32 %v484_v35 }
  0xa6   : > { %s1926_s15 = sld [smem:[#allocation5 + %s641_s17]]  ;;  %s655_s23 = sadd.s32 77, %s1610_s20  ;;  %v669_v58 = vmul.f32 %v668_v43, %v665_v49  ;;  %v551_v30 = vsub.f32 %v543_v39, %v549_v62  ;;  %v614_v59 = vmul.f32 %v607_v63, %v607_v63  ;;  %v619_v1 = vmul.f32 %v607_v63, %v597_v24 }
  0xa7   : > { %s682_s7 = sadd.s32 46, %s1610_s20  ;;  %s689_s16 = smul.f32 2.0, %s1893_s25  ;;  %v678_v4 = vmul.f32 %v677_v51, %v673_v54  ;;  %1253 = vpow2.f32 %v486_v38  ;;  %v552_v25 = vsub.f32 %v544_v44, %v550_v41  ;;  %v615_v6 = vadd.f32 %v613_v5, %v612_v42 }
  0xa8   : > { %s1946_s21 = sld [smem:[#allocation5 + %s742_s1]]  ;;  %s747_s3 = sadd.s32 15, %s1610_s20  ;;  %v621_v29 = vmul.f32 %v620_v53, %v618_v48  ;;  %v1958_v7 = vadd.f32 %v436_v27, %v1828_v36  ;;  %v679_v8 = vmul.f32 %v677_v51, %v674_v55  ;;  %v684_v9 = vmul.f32 %v669_v58, %v669_v58 }
  0xa9   : > { %s1948_s27 = sld [smem:[#allocation5 + %s738_s19]]  ;;  %v685_v13 = vmul.f32 %v678_v4, %v678_v4  ;;  %s752_s1 = sadd.s32 39, %s1610_s20  ;;  %v1964_v3 = vadd.f32 %v443_v34, %v1830_v37  ;;  %v571_v17 = vstv %s1888_s9  ;;  %v690_v18 = vmul.f32 %v678_v4, %v669_v58 }
  0xaa   : > { %s1953_s2 = sld [smem:[#allocation5 + %s648_s6]]  ;;  %v692_v19 = vstv %s689_s16  ;;  %v554_v36 = vsub.f32 %v553_v60, %v551_v30  ;;  %v616_v20 = vadd.f32 %v614_v59, %v612_v42  ;;  %v622_v22 = vmul.f32 %v620_v53, %v619_v1  ;;  %s754_s14 = sadd.s32 47, %s1610_s20 }
  0xab   : > { %s1955_s25 = sld [smem:[#allocation5 + %s655_s23]]  ;;  %v736_v21 = vstv %s1923_s26  ;;  %v555_v24 = vsub.f32 %v553_v60, %v552_v25  ;;  %v578_v26 = vstv %s1891_s29  ;;  %v585_v28 = vstv %s1898_s22  ;;  %s713_s26 = sadd.s32 62, %s1610_s20 }
  0xac   : > { %s1960_s17 = sld [smem:[#allocation5 + %s682_s7]]  ;;  %v623_v37 = vsub.f32 %v615_v6, %v621_v29  ;;  %v625_v32 = vstv %s1911_s28  ;;  %v686_v33 = vmul.f32 %v679_v8, %v679_v8  ;;  %v687_v27 = vadd.f32 %v685_v13, %v684_v9  ;;  %s706_s28 = sadd.s32 54, %s1610_s20 }
  0xad   : > { %s1967_s6 = sld [smem:[#allocation5 + %s747_s3]]  ;;  %v693_v34 = vmul.f32 %v692_v19, %v690_v18  ;;  %v636_v35 = vstv %s1919_s4  ;;  %v691_v38 = vmul.f32 %v679_v8, %v669_v58  ;;  %v737_v12 = vsub.f32 %v1624_v10, %v736_v21  ;;  %s720_s23 = sadd.s32 70, %s1610_s20 }
  0xae   : > { %s1976_s19 = sld [smem:[#allocation5 + %s752_s1]]  ;;  %v744_v39 = vstv %s1946_s21  ;;  %v556_v60 = vmul.f32 1.442695, %v554_v36  ;;  %v624_v44 = vsub.f32 %v616_v20, %v622_v22  ;;  %v643_v62 = vstv %s1926_s15  ;;  %s727_s21 = sadd.s32 78, %s1610_s20 }
  0xaf   : > { %v740_v41 = vstv %s1948_s27  ;;  %v1252_v63 = vpop.eup %1251  ;;  %v558_v42 = vmul.f32 1.442695, %v555_v24  ;;  %v626_v5 = vsub.f32 %v625_v32, %v623_v37  ;;  %v688_v49 = vadd.f32 %v686_v33, %v684_v9  ;;  %s2003_s7 = sld [smem:[#allocation5 + %s754_s14]]  ;;  %s778_s10 = sadd.s32 55, %s1610_s20 }
  0xb0   : > { %v650_v43 = vstv %s1953_s2  ;;  %v695_v50 = vsub.f32 %v687_v27, %v693_v34  ;;  %v745_v10 = vsub.f32 %v1626_v11, %v744_v39  ;;  %v694_v54 = vmul.f32 %v692_v19, %v691_v38  ;;  %s2012_s27 = sld [smem:[#allocation5 + %s706_s28]]  ;;  %s785_s8 = sadd.s32 63, %s1610_s20 }
  0xb1   : > { %v657_v48 = vstv %s1955_s25  ;;  %v1254_v53 = vpop.eup %1253  ;;  %v741_v55 = vmul.f32 %v740_v41, %v737_v12  ;;  %v746_v58 = vsub.f32 %v1632_v14, %v744_v39  ;;  %v1993_v59 = vadd.f32 %v1252_v63, %v1863_v0  ;;  %s2014_s3 = sld [smem:[#allocation5 + %s713_s26]]  ;;  %s792_s0 = sadd.s32 71, %s1610_s20 }
  0xb2   : > { %v697_v51 = vstv %s1960_s17  ;;  %1255 = vpow2.f32 %v556_v60  ;;  %v627_v1 = vsub.f32 %v625_v32, %v624_v44  ;;  %v493_v4 = vmul.f32 %v1252_v63, %v492_v40  ;;  %s2020_s30 = sld [smem:[#allocation5 + %s720_s23]] }
  0xb3   : > { %v749_v30 = vstv %s1967_s6  ;;  %v500_v25 = vmul.f32 %v1252_v63, %v499_v45  ;;  %v507_v6 = vmul.f32 %v1252_v63, %v506_v46  ;;  %v628_v29 = vmul.f32 1.442695, %v626_v5  ;;  %s2025_s17 = sld [smem:[#allocation5 + %s727_s21]]  ;;  %s799_s6 = sadd.s32 79, %s1610_s20 }
  0xb4   : > { %v750_v11 = vmul.f32 %v749_v30, %v745_v10  ;;  %s761_s16 = smul.f32 2.0, %s1976_s19  ;;  %v2007_v14 = vadd.f32 %v1254_v53, %v1903_v31  ;;  %v494_v0 = vmul.f32 %v1254_v53, %v492_v40  ;;  %1257 = vpow2.f32 %v558_v42  ;;  %s2057_s1 = sld [smem:[#allocation5 + %s778_s10]] }
  0xb5   : > { %v698_v8 = vsub.f32 %v697_v51, %v695_v50  ;;  %v696_v9 = vsub.f32 %v688_v49, %v694_v54  ;;  %v751_v13 = vmul.f32 %v749_v30, %v746_v58  ;;  %v756_v18 = vmul.f32 %v741_v55, %v741_v55  ;;  %s2064_s11 = sld [smem:[#allocation5 + %s785_s8]] }
  0xb6   : > { %v757_v19 = vmul.f32 %v750_v11, %v750_v11  ;;  %v501_v36 = vmul.f32 %v1254_v53, %v499_v45  ;;  %v508_v31 = vmul.f32 %v1254_v53, %v506_v46  ;;  %v630_v20 = vmul.f32 1.442695, %v627_v1  ;;  %s2070_s9 = sld [smem:[#allocation5 + %s792_s0]] }
  0xb7   : > { %v762_v40 = vmul.f32 %v750_v11, %v741_v55  ;;  %v495_v22 = vadd.f32 %v493_v4, %v1881_v15  ;;  %v514_v21 = vmul.f32 %v1252_v63, %v513_v47  ;;  %1259 = vpow2.f32 %v628_v29  ;;  %s2075_s20 = sld [smem:[#allocation5 + %s799_s6]] }
  0xb8   : > { %v764_v24 = vstv %s761_s16  ;;  %v502_v37 = vadd.f32 %v500_v25, %v1884_v16  ;;  %v509_v32 = vadd.f32 %v507_v6, %v1896_v23  ;;  %v515_v45 = vmul.f32 %v1254_v53, %v513_v47 }
  0xb9   : > { %v700_v46 = vmul.f32 1.442695, %v698_v8  ;;  %v496_v33 = vadd.f32 %v494_v0, %v1940_v56  ;;  %v699_v27 = vsub.f32 %v697_v51, %v696_v9  ;;  %v758_v34 = vmul.f32 %v751_v13, %v751_v13 }
  0xba   : > { %v759_v15 = vadd.f32 %v757_v19, %v756_v18  ;;  %v503_v38 = vadd.f32 %v501_v36, %v1943_v57  ;;  %1261 = vpow2.f32 %v630_v20  ;;  %v763_v12 = vmul.f32 %v751_v13, %v741_v55 }
  0xbb   : > { %v765_v39 = vmul.f32 %v764_v24, %v762_v40  ;;  %v510_v16 = vadd.f32 %v508_v31, %v1958_v7  ;;  %v516_v47 = vadd.f32 %v514_v21, %v1933_v52  ;;  %v760_v23 = vadd.f32 %v758_v34, %v756_v18 }
  0xbc   : > { %v769_v56 = vstv %s2003_s7  ;;  %v1256_v60 = vpop.eup %1255  ;;  %v517_v44 = vadd.f32 %v515_v45, %v1964_v3  ;;  %1263 = vpow2.f32 %v700_v46  ;;  %v766_v57 = vmul.f32 %v764_v24, %v763_v12 }
  0xbd   : > { %v767_v41 = vsub.f32 %v759_v15, %v765_v39  ;;  %v565_v63 = vmul.f32 %v1256_v60, %v564_v61  ;;  %v702_v7 = vmul.f32 1.442695, %v699_v27  ;;  %v708_v42 = vstv %s2012_s27 }
  0xbe   : > { %v715_v52 = vstv %s2014_s3  ;;  %v1258_v5 = vpop.eup %1257  ;;  %v572_v49 = vmul.f32 %v1256_v60, %v571_v17  ;;  %v722_v3 = vstv %s2020_s30  ;;  %v768_v50 = vsub.f32 %v760_v23, %v766_v57 }
  0xbf   : > { %v770_v51 = vsub.f32 %v769_v56, %v767_v41  ;;  %v560_v10 = vadd.f32 %v1256_v60, %v1993_v59  ;;  %v566_v53 = vmul.f32 %v1258_v5, %v564_v61  ;;  %v579_v54 = vmul.f32 %v1256_v60, %v578_v26 }
  0xc0   : > { %v729_v55 = vstv %s2025_s17  ;;  %v573_v58 = vmul.f32 %v1258_v5, %v571_v17  ;;  %v586_v30 = vmul.f32 %v1256_v60, %v585_v28  ;;  %v771_v1 = vsub.f32 %v769_v56, %v768_v50 }
  0xc1   : > { %v772_v11 = vmul.f32 1.442695, %v770_v51  ;;  %v1260_v4 = vpop.eup %1259  ;;  %v567_v59 = vadd.f32 %v565_v63, %v495_v22  ;;  %v580_v61 = vmul.f32 %v1258_v5, %v578_v26  ;;  %v587_v25 = vmul.f32 %v1258_v5, %v585_v28 }
  0xc2   : > { %1265 = vpow2.f32 %v702_v7  ;;  %v574_v6 = vadd.f32 %v572_v49, %v502_v37  ;;  %v637_v17 = vmul.f32 %v1260_v4, %v636_v35  ;;  %v644_v29 = vmul.f32 %v1260_v4, %v643_v62 }
  0xc3   : > { %1267 = vpow2.f32 %v772_v11  ;;  %v561_v0 = vadd.f32 %v1258_v5, %v2007_v14  ;;  %v568_v8 = vadd.f32 %v566_v53, %v496_v33  ;;  %v581_v26 = vadd.f32 %v579_v54, %v509_v32 }
  0xc4   : > { %v651_v28 = vmul.f32 %v1260_v4, %v650_v43  ;;  %v1262_v9 = vpop.eup %1261  ;;  %v575_v13 = vadd.f32 %v573_v58, %v503_v38  ;;  %v588_v18 = vadd.f32 %v586_v30, %v516_v47  ;;  %v658_v19 = vmul.f32 %v1260_v4, %v657_v48 }
  0xc5   : > { %v774_v36 = vmul.f32 1.442695, %v771_v1  ;;  %v582_v31 = vadd.f32 %v580_v61, %v510_v16  ;;  %v589_v14 = vadd.f32 %v587_v25, %v517_v44  ;;  %v632_v20 = vadd.f32 %v1260_v4, %v560_v10 }
  0xc6   : > { %v638_v40 = vmul.f32 %v1262_v9, %v636_v35  ;;  %v1264_v22 = vpop.eup %1263  ;;  %v639_v21 = vadd.f32 %v637_v17, %v567_v59  ;;  %v645_v24 = vmul.f32 %v1262_v9, %v643_v62  ;;  %v646_v37 = vadd.f32 %v644_v29, %v574_v6 }
  0xc7   : > { %v652_v32 = vmul.f32 %v1262_v9, %v650_v43  ;;  %v653_v45 = vadd.f32 %v651_v28, %v581_v26  ;;  %v709_v46 = vmul.f32 %v1264_v22, %v708_v42  ;;  %v716_v33 = vmul.f32 %v1264_v22, %v715_v52 }
  0xc8   : > { %v723_v27 = vmul.f32 %v1264_v22, %v722_v3  ;;  %v660_v34 = vadd.f32 %v658_v19, %v588_v18  ;;  %v730_v35 = vmul.f32 %v1264_v22, %v729_v55  ;;  %1269 = vpow2.f32 %v774_v36 }
  0xc9   : > { %v780_v15 = vstv %s2057_s1  ;;  %v633_v62 = vadd.f32 %v1262_v9, %v561_v0  ;;  %v640_v38 = vadd.f32 %v638_v40, %v568_v8  ;;  %v704_v43 = vadd.f32 %v1264_v22, %v632_v20 }
  0xca   : > { %v787_v12 = vstv %s2064_s11  ;;  %v647_v39 = vadd.f32 %v645_v24, %v575_v13  ;;  %v654_v16 = vadd.f32 %v652_v32, %v582_v31  ;;  %v659_v47 = vmul.f32 %v1262_v9, %v657_v48 }
  0xcb   : > { %v794_v23 = vstv %s2070_s9  ;;  %v711_v60 = vadd.f32 %v709_v46, %v639_v21  ;;  %v718_v44 = vadd.f32 %v716_v33, %v646_v37  ;;  %v725_v57 = vadd.f32 %v723_v27, %v653_v45 }
  0xcc   : > { %v1266_v56 = vpop.eup %1265  ;;  %v801_v41 = vstv %s2075_s20  ;;  %v732_v50 = vadd.f32 %v730_v35, %v660_v34  ;;  %v661_v48 = vadd.f32 %v659_v47, %v589_v14  ;;  %v1425_v31 = vmov 0.0  }
  0xcd   : > { %v1268_v63 = vpop.eup %1267  ;;  %v710_v7 = vmul.f32 %v1266_v56, %v708_v42  ;;  %v717_v5 = vmul.f32 %v1266_v56, %v715_v52  ;;  %v724_v49 = vmul.f32 %v1266_v56, %v722_v3  ;;  %v731_v58 = vmul.f32 %v1266_v56, %v729_v55  ;;  %846 = vst.msk [vmem:[#allocation4] sm:$0x1] %vm845_vm1, %v1425_v31 }
  0xce   : > { %v776_v51 = vadd.f32 %v1268_v63, %v704_v43  ;;  %v781_v10 = vmul.f32 %v1268_v63, %v780_v15  ;;  %v788_v53 = vmul.f32 %v1268_v63, %v787_v12  ;;  %v795_v54 = vmul.f32 %v1268_v63, %v794_v23 }
  0xcf   : > { %v802_v30 = vmul.f32 %v1268_v63, %v801_v41  ;;  %v705_v1 = vadd.f32 %v1266_v56, %v633_v62  ;;  %v712_v52 = vadd.f32 %v710_v7, %v640_v38  ;;  %v719_v61 = vadd.f32 %v717_v5, %v647_v39 }
  0xd0   : > { %v783_v11 = vadd.f32 %v781_v10, %v711_v60  ;;  %v790_v4 = vadd.f32 %v788_v53, %v718_v44  ;;  %v797_v59 = vadd.f32 %v795_v54, %v725_v57  ;;  %807 = vst [vmem:[#allocation2] sm:$0xff] %v776_v51  ;;  %v726_v3 = vadd.f32 %v724_v49, %v654_v16 }
  0xd1   : > { %v804_v42 = vadd.f32 %v802_v30, %v732_v50  ;;  %v733_v6 = vadd.f32 %v731_v58, %v661_v48  ;;  %v829_v55 = vsel %vm826_vm0, %v776_v51, 0.0 }
  0xd2   : > { %810 = vst [vmem:[#allocation3] sm:$0xff] %v783_v11  ;;  %1109 = vst [vmem:[#allocation3 + $0x10] sm:$0xff] %v790_v4  ;;  %v1270_v25 = vpop.eup %1269 }
  0xd3   : > { %1111 = vst [vmem:[#allocation3 + $0x20] sm:$0xff] %v797_v59  ;;  %1113 = vst [vmem:[#allocation3 + $0x30] sm:$0xff] %v804_v42  ;;  %v777_v17 = vadd.f32 %v1270_v25, %v705_v1  ;;  %v782_v29 = vmul.f32 %v1270_v25, %v780_v15  ;;  %v789_v0 = vmul.f32 %v1270_v25, %v787_v12 }
  0xd4   : > { %v796_v8 = vmul.f32 %v1270_v25, %v794_v23  ;;  %v803_v26 = vmul.f32 %v1270_v25, %v801_v41  ;;  %v847_v2 = vld [vmem:[#allocation4] sm:$0x1] }
  0xd5   : > { %v784_v28 = vadd.f32 %v782_v29, %v712_v52  ;;  %v791_v9 = vadd.f32 %v789_v0, %v719_v61  ;;  %808 = vst [vmem:[#allocation2 + $0x8] sm:$0xff] %v777_v17  ;;  %v830_v18 = vsel %vm826_vm0, %v777_v17, 0.0 }
  0xd6   : > { %v798_v13 = vadd.f32 %v796_v8, %v726_v3  ;;  %v805_v19 = vadd.f32 %v803_v26, %v733_v6  ;;  %v831_v36 = vmax.f32 %v829_v55, %v830_v18 }
  0xd7   : > { %811 = vst [vmem:[#allocation3 + $0x8] sm:$0xff] %v784_v28  ;;  %1110 = vst [vmem:[#allocation3 + $0x18] sm:$0xff] %v791_v9 }
  0xd8   : > { %1112 = vst [vmem:[#allocation3 + $0x28] sm:$0xff] %v798_v13  ;;  %1114 = vst [vmem:[#allocation3 + $0x38] sm:$0xff] %v805_v19  ;;  %832 = vmax.xlane.f32.xlu0 %v831_v36 }
 0x165   : > { %v833_v14 = vpop.xlane.xlu0 %832 }
 0x166   : > { %v834_v20 = vrot.slane %v833_v14, 4 }
 0x168   : > { %v835_v40 = vmax.f32 %v833_v14, %v834_v20 }
 0x16a   : > { %v836_v22 = vrot.slane %v835_v40, 2 }
 0x16c   : > { %v837_v21 = vmax.f32 %v835_v40, %v836_v22 }
 0x16e   : > { %v838_v24 = vrot.slane %v837_v21, 1 }
 0x170   : > { %v839_v37 = vmax.f32 %v837_v21, %v838_v24 }
 0x172   : > { %1142 = vpush %v839_v37 }
 0x1a3   : > { %s1143_s29 = spop %1142 }
 0x1a4   : > { %v848_v32 = vstv %s1143_s29 }
 0x1a5   : > { %v849_v45 = vmax.f32 %v847_v2, %v848_v32 }
 0x1a7   : > { %851 = vst.msk [vmem:[#allocation4] sm:$0x1] %vm845_vm1, %v849_v45 }
 0x1a8 PF: > { %p1115_p8 = scmp.ne.s32.totalorder %s1403_s12, 1 }
 0x1a9   : > { %s1116_s22 = sshll.u32 (!%p1115_p8), %s1407_s13, 7  ;;  %v1426_v33 = vmov (!%p1115_p8), 0   ;;  %v876_v27 = vlaneseq (!%p1115_p8)  ;;  %v864_v12 = vld [vmem:[#allocation2] sm:$0xff] (!%p1115_p8)  ;;  %v865_v39 = vld [vmem:[#allocation2 + $0x8] sm:$0xff] (!%p1115_p8)  ;;  %v866_v16 = vld [vmem:[%s1600_s18] sm:$0xff] (!%p1115_p8) }
 0x1aa   : > { %855 = sbr.rel (%p1115_p8) target bundleno = 582 (0x246), region = 48  ;;  %1271 = vset.pattern.permute.xlu0 (!%p1115_p8), %v1426_v33  ;;  %s857_s4 = sadd.s32 (!%p1115_p8), 80, %s1116_s22  ;;  %v867_v47 = vld [vmem:[%s1600_s18 + $0x8] sm:$0xff] (!%p1115_p8)  ;;  %v1117_v23 = vld [vmem:[%s1600_s18 + $0x10] sm:$0xff] (!%p1115_p8)  ;;  %v1118_v56 = vld [vmem:[%s1600_s18 + $0x18] sm:$0xff] (!%p1115_p8)  ;;  %v871_v5 = vmul.f32 (!%p1115_p8), %v866_v16, %v864_v12 }
 0x1ab   : > { %s858_s15 = sld [smem:[#allocation5 + %s857_s4]] (!%p1115_p8)  ;;  %v877_v34 = vshrl.u32 (!%p1115_p8), %v876_v27, 7  ;;  %v1123_v60 = vld [vmem:[%s1600_s18 + $0x20] sm:$0xff] (!%p1115_p8)  ;;  %v1124_v44 = vld [vmem:[%s1600_s18 + $0x28] sm:$0xff] (!%p1115_p8)  ;;  %v1129_v57 = vld [vmem:[%s1600_s18 + $0x30] sm:$0xff] (!%p1115_p8)  ;;  %v872_v49 = vmul.f32 (!%p1115_p8), %v867_v47, %v865_v39  ;;  %v897_v50 = vmul.f32 (!%p1115_p8), %v1117_v23, %v864_v12  ;;  %v898_v51 = vmul.f32 (!%p1115_p8), %v1118_v56, %v865_v39 }
 0x1ac   : > { %v1130_v41 = vld [vmem:[%s1600_s18 + $0x38] sm:$0xff] (!%p1115_p8)  ;;  %v870_v7 = vld [vmem:[#allocation3 + $0x8] sm:$0xff] (!%p1115_p8)  ;;  %v1119_v10 = vld [vmem:[#allocation3 + $0x10] sm:$0xff] (!%p1115_p8)  ;;  %v915_v48 = vmul.f32 (!%p1115_p8), %v1123_v60, %v864_v12  ;;  %v916_v58 = vmul.f32 (!%p1115_p8), %v1124_v44, %v865_v39  ;;  %v933_v30 = vmul.f32 (!%p1115_p8), %v1129_v57, %v864_v12 }
 0x1ad   : > { %v878_v15 = vsub.s32 (!%p1115_p8), 0, %v877_v34  ;;  %v869_v63 = vld [vmem:[#allocation3] sm:$0xff] (!%p1115_p8)  ;;  %v1120_v53 = vld [vmem:[#allocation3 + $0x18] sm:$0xff] (!%p1115_p8)  ;;  %v934_v1 = vmul.f32 (!%p1115_p8), %v1130_v41, %v865_v39  ;;  %v1126_v11 = vld [vmem:[#allocation3 + $0x28] sm:$0xff] (!%p1115_p8)  ;;  %v874_v52 = vsub.f32 (!%p1115_p8), %v870_v7, %v872_v49  ;;  %v899_v61 = vsub.f32 (!%p1115_p8), %v1119_v10, %v897_v50 }
 0x1ae   : > { %v859_v46 = vld [vmem:[#allocation4] sm:$0x1] (!%p1115_p8)  ;;  %v1131_v4 = vld [vmem:[#allocation3 + $0x30] sm:$0xff] (!%p1115_p8)  ;;  %v1132_v59 = vld [vmem:[#allocation3 + $0x38] sm:$0xff] (!%p1115_p8)  ;;  %v873_v42 = vsub.f32 (!%p1115_p8), %v869_v63, %v871_v5  ;;  %v900_v3 = vsub.f32 (!%p1115_p8), %v1120_v53, %v898_v51  ;;  %v918_v6 = vsub.f32 (!%p1115_p8), %v1126_v11, %v916_v58 }
 0x1af   : > { %1272 = vrcp.f32 (!%p1115_p8), %v859_v46  ;;  %v1125_v54 = vld [vmem:[#allocation3 + $0x20] sm:$0xff] (!%p1115_p8)  ;;  %v935_v55 = vsub.f32 (!%p1115_p8), %v1131_v4, %v933_v30  ;;  %v936_v17 = vsub.f32 (!%p1115_p8), %v1132_v59, %v934_v1 }
 0x1b0   : > { %v917_v25 = vsub.f32 (!%p1115_p8), %v1125_v54, %v915_v48 }
 0x1b1   : > { %v860_v35 = vstv %s858_s15 }
 0x1b9   : > { %v1273_v62 = vpop.eup %1272 }
 0x1ba   : > { %v862_v38 = vmul.f32 %v1273_v62, %v860_v35 }
 0x1bc   : > { %v879_v43 = vrot.slane %v862_v38, %v878_v15 }
 0x1be   : > { %881 = vperm.xlu0 %1271, %v879_v43  }
 0x23d   : > { %v882_v29 = vpop.permute.xlu0 %881 }
 0x23e   : > { %v884_v0 = vmul.f32 %v882_v29, %v873_v42  ;;  %v885_v8 = vmul.f32 %v882_v29, %v874_v52  ;;  %v901_v26 = vmul.f32 %v899_v61, %v882_v29  ;;  %v902_v28 = vmul.f32 %v900_v3, %v882_v29 }
 0x23f   : > { %v919_v9 = vmul.f32 %v917_v25, %v882_v29  ;;  %v920_v13 = vmul.f32 %v918_v6, %v882_v29  ;;  %v937_v18 = vmul.f32 %v935_v55, %v882_v29  ;;  %v938_v19 = vmul.f32 %v936_v17, %v882_v29 }
 0x240   : > { %v886_v36 = vadd.f32 %v884_v0, %v866_v16  ;;  %v887_v31 = vadd.f32 %v885_v8, %v867_v47  ;;  %v903_v14 = vadd.f32 %v1117_v23, %v901_v26  ;;  %v904_v20 = vadd.f32 %v1118_v56, %v902_v28 }
 0x241   : > { %v921_v40 = vadd.f32 %v1123_v60, %v919_v9  ;;  %v922_v22 = vadd.f32 %v1124_v44, %v920_v13  ;;  %v939_v21 = vadd.f32 %v1129_v57, %v937_v18  ;;  %v940_v24 = vadd.f32 %v1130_v41, %v938_v19 }
 0x242   : > { %888 = vst [vmem:[%s1606_s24] sm:$0xff] %v886_v36  ;;  %889 = vst [vmem:[%s1606_s24 + $0x8] sm:$0xff] %v887_v31 }
 0x243   : > { %1121 = vst [vmem:[%s1606_s24 + $0x10] sm:$0xff] %v903_v14  ;;  %1122 = vst [vmem:[%s1606_s24 + $0x18] sm:$0xff] %v904_v20 }
 0x244   : > { %1127 = vst [vmem:[%s1606_s24 + $0x20] sm:$0xff] %v921_v40  ;;  %1128 = vst [vmem:[%s1606_s24 + $0x28] sm:$0xff] %v922_v22 }
 0x245   : > { %1133 = vst [vmem:[%s1606_s24 + $0x30] sm:$0xff] %v939_v21  ;;  %1134 = vst [vmem:[%s1606_s24 + $0x38] sm:$0xff] %v940_v24 }
 0x246 PF: > { %s2235_s12 = sld [smem:[#allocation20_spill]]  ;;  %s1141_s18 = sshll.u32 %s1407_s13, 10 }
 0x247   : > { %s2236_s19 = sld [smem:[#allocation27_spill]]  ;;  %s961_s28 = sshll.u32 %s1606_s24, 4  ;;  %s2137_s28 = int_to_ptr.vmem [resolvable:$true] %s961_s28 }
 0x248   : > { %s945_s26 = scalar_lea.sflag [#allocation7], %s1596_s5  ;;  %s1317_s23 = scalar_lea.vmem %s2137_s28, 1024 }
 0x249   : > { %p1318_p12 = scmp.ne.s32.totalorder %s2137_s28, %s1317_s23  ;;  %s1427_s7 = smov [#allocation10]  }
 0x24a   : > { %s1321_s16 = sshll.u32 %s1427_s7, 4  ;;  %s1322_s16 = int_to_ptr.vmem [resolvable:$false] %s1321_s16 }
 0x24b   : > { %s1323_s13 = scalar_lea.vmem %s1322_s16, 2048  ;;  %p1324_p1 = scmp.lt.s32.totalorder %s2137_s28, %s1322_s16 }
 0x24c   : > { %p2237_p6 = scmp.ne.s32.totalorder %s2235_s12, 0  ;;  %p1325_p0 = scmp.lt.s32.totalorder %s1323_s13, %s1317_s23 }
 0x24d   : > { %s2134_s14 = scalar_lea.hbm %s2236_s19, %s1141_s18 }
 0x24e   : > { %p1319_p13 = pnand %p1318_p12, %p2237_p6  ;;  %p1326_p2 = por %p1325_p0, %p1324_p1 }
 0x250   : > { %p1320_p9 = pneg %p1319_p13 }
 0x252   : > { %p1327_p10 = pnand %p1326_p2, %p1320_p9 }
 0x254   : > { %1330 = shalt.err (!%p1327_p10)
}
 0x255   : > { %s1331_s24 = scalar_lea.hbm %s2134_s14, 1024  ;;  %s1335_s3 = scalar_lea.hbm %s2236_s19, 2048 }
 0x256   : > { %p1332_p11 = scmp.ne.s32.totalorder %s2134_s14, %s1331_s24  ;;  %p1336_p3 = scmp.lt.u32.totalorder %s2134_s14, %s2236_s19 }
 0x257   : > { %p1337_p7 = scmp.lt.u32.totalorder %s1335_s3, %s1331_s24  ;;  %p1339_p12 = scmp.lt.u32.totalorder %s1331_s24, %s2134_s14 }
 0x258   : > { %p1333_p5 = pnand %p1332_p11, %p2237_p6 }
 0x259   : > { %p1338_p8 = por %p1337_p7, %p1336_p3 }
 0x25a   : > { %p1334_p4 = pneg %p1333_p5 }
 0x25b   : > { %p1340_p13 = por %p1339_p12, %p1338_p8 }
 0x25d   : > { %p1341_p9 = pnand %p1340_p13, %p1334_p4 }
 0x25f   : > { %1344 = shalt.err (!%p1341_p9)
}
 0x260   : > { %s1428_s10 = smov 128   ;;  %s1429_s8 = smov 8  }
 0x261   : > { %1150 = dma.vmem_to_hbm [thread:$0]  (%p2237_p6), %s2137_s28, 1024, %s2134_s14, %s945_s26, %s1428_s10, %s1428_s10, %s1429_s8  }
 0x262 PF: > { %s2238_s0 = sld [smem:[#allocation19_spill]]  ;;  %s2239_s1 = sld [smem:[#allocation14_spill]] }
 0x263   : > { %s2240_s6 = sld [smem:[#allocation21_spill]] }
 0x268   : > { %p1167_p1 = scmp.ge.s32.totalorder %s2238_s0, 2  ;;  %s976_s11 = sand.u32 1, %s2239_s1  }
 0x269   : > { %p2241_p0 = scmp.ne.s32.totalorder %s2240_s6, 0  ;;  %s977_s9 = scalar_lea.sflag [#allocation7], %s976_s11 }
 0x26b   : > { %p1161_p2 = pnand %p1167_p1, %p2241_p0 }
 0x26d   : > { %1386 = dma.done.wait (!%p1161_p2), %s977_s9, 1024  }
 0x26e   : > { %1388 = vsyncadd (!%p1161_p2), %s977_s9, 4294966272  ;;  %s19_s16 = sadd.s32 1, %s2238_s0   ;;  %s2242_s9 = sld [smem:[#allocation15_spill]] }
 0x26f   : > { %p16_p10 = scmp.ge.s32.totalorder %s19_s16, 6   ;;  %s2243_s10 = sld [smem:[#allocation16_spill]] }
 0x270   : > { %s2244_s11 = sld [smem:[#allocation24_spill]]  ;;  %s2245_s12 = sld [smem:[#allocation17_spill]] }
 0x271   : > { %s2246_s13 = sld [smem:[#allocation18_spill]]  ;;  %s2247_s14 = sld [smem:[#allocation22_spill]] }
 0x272   : > { %s2248_s15 = sld [smem:[#allocation23_spill]]  ;;  %18 = sbr.rel (!%p16_p10) target bundleno = 12 (0xc), region = 106 }
 0x279   :  { %982 = vsyncpa [#allocation6], 1 }
 0x27a   :  { %984 = vsyncpa [#allocation6 + $0x1], 1 }
 0x27b   :  { %985 = vsyncpa [#allocation7], 1 }
 0x27c   :  { %987 = vsyncpa [#allocation7 + $0x1], 1 }
 0x27d   :  { %988 = vsyncpa [#allocation8], 1 }
 0x27e   :  { %990 = vsyncpa [#allocation8 + $0x1], 1 }

</bundles_post_ra>
